<compile_context>
chip_gen: v7x
topology: tpu7x:2x2x1
jax: 0.10.0
libtpu: 0.0.40
codegen_flags: <defaults>
</compile_context>

<pallas_src>
import functools

import numpy as np
import jax
import jax.numpy as jnp
from jax.experimental import pallas as pl
from jax.experimental.pallas import tpu as pltpu


def _pool_matmul_kernel(p_ref, x_ref, o_ref):
    # p_ref: (2*H*W, 2*Ho*Wo) block-diagonal pooling matrix; constant
    #        index_map -> fetched once, resident in VMEM for every grid step.
    # x_ref: (TB, 2*H*W)   lane-dense rows: [flattened re plane | im plane].
    # o_ref: (TB, 2*Ho*Wo) lane-dense rows: [pooled re | pooled im].
    o_ref[...] = jnp.dot(
        x_ref[...], p_ref[...],
        preferred_element_type=jnp.float32,
        precision=jax.lax.Precision.HIGHEST)


@functools.lru_cache(maxsize=None)
def _pooling_matrix(H, W, k):
    """Block-diagonal pooling matrix (2*H*W, 2*Ho*Wo), entries 1/k^2.

    Built with numpy once per (H, W, k) and cached as a device array, so no
    per-call on-device construction pass is needed.
    """
    Ho, Wo = H // k, W // k
    HW, HoWo = H * W, Ho * Wo
    hw = np.arange(HW)
    col = (hw // W // k) * Wo + (hw % W) // k       # ho*Wo + wo per pixel
    p = np.zeros((2 * HW, 2 * HoWo), np.float32)
    inv = 1.0 / float(k * k)
    p[hw, col] = inv                                # real-plane block
    p[HW + hw, HoWo + col] = inv                    # imag-plane block
    return jnp.asarray(p)


def _choose_block_rows(num_rows, row_elems, target_bytes=4 << 20):
    """Rows per block: ~4 MiB blocks, multiple of 8, >= 2 grid steps if possible."""
    if num_rows <= 8:
        return num_rows                       # full dim -> always a legal block
    tb = min(num_rows, max(8, target_bytes // (row_elems * 4)))
    tb = max(8, (tb // 8) * 8)                # 2nd-to-last block dim must be %8
    if tb >= num_rows:
        # Keep >= 2 grid steps so the "parallel" axis can span both v7x cores.
        tb = max(8, ((num_rows + 1) // 2 // 8) * 8)
    return min(tb, num_rows)


@functools.partial(jax.jit, static_argnums=(2,))
def _pool_impl(x, p2, k):
    N, C, H, W = x.shape
    Ho, Wo = H // k, W // k
    HW, HoWo = H * W, Ho * Wo
    NC = N * C

    # Single fused XLA pass: complex64 (N,C,H,W) -> f32 (NC, 2*H*W) rows that
    # pack [flattened real plane | flattened imag plane] per (n, c).
    xr = jnp.real(x).reshape(NC, HW)
    xi = jnp.imag(x).reshape(NC, HW)
    xf = jnp.concatenate([xr, xi], axis=-1)

    tb = _choose_block_rows(NC, 2 * HW)
    grid = (pl.cdiv(NC, tb),)
    # NOTE: if NC % tb != 0 the last block is partial; BlockSpec auto-pipelining
    # masks the out-of-bounds output rows (correct). Do not switch this output
    # to manual DMA / input_output_aliases without handling that explicitly.

    pooled = pl.pallas_call(
        _pool_matmul_kernel,
        grid=grid,
        in_specs=[
            pl.BlockSpec((2 * HW, 2 * HoWo), lambda i: (0, 0)),   # resident P2
            pl.BlockSpec((tb, 2 * HW), lambda i: (i, 0)),
        ],
        out_specs=pl.BlockSpec((tb, 2 * HoWo), lambda i: (i, 0)),
        out_shape=jax.ShapeDtypeStruct((NC, 2 * HoWo), jnp.float32),
        compiler_params=pltpu.CompilerParams(
            dimension_semantics=("parallel",),      # row axis shards across TCs
            vmem_limit_bytes=32 * 1024 * 1024,
            # Allow XLA to fuse the real/imag packing into the kernel's input
            # instead of materializing xf in HBM (P2 is a plain device array).
            allow_input_fusion=[False, True],
        ),
    )(p2, xf)

    pooled = pooled.reshape(N, C, 2, Ho, Wo)
    return jax.lax.complex(pooled[:, :, 0], pooled[:, :, 1])


def magnitude_average_pool(x, kernel_size=2, stride=None, padding=0):
    """Complex 2D average pooling (MagnitudeAvgPool2D forward; see TODO above).

    x: complex64 array of shape (N, C, H, W). padding must be 0; stride
    defaults to kernel_size (PyTorch AvgPool2d default).
    """
    k = int(kernel_size)
    s = k if stride is None else int(stride)
    if padding != 0:
        raise NotImplementedError("only padding=0 supported")
    if s != k:
        raise NotImplementedError("only stride == kernel_size supported")
    N, C, H, W = x.shape
    assert H % k == 0 and W % k == 0, "H, W must be divisible by kernel_size"
    # Dense pooling-matrix path only for small planes (P2 <= 4 MiB).
    assert (2 * H * W) * (2 * (H // k) * (W // k)) * 4 <= (4 << 20), (
        "plane too large for the dense pooling-matrix path; "
        "TODO(synk): separable two-stage pooling")
    p2 = _pooling_matrix(H, W, k)
    return _pool_impl(x, p2, k)


if __name__ == "__main__":
    key = jax.random.PRNGKey(0)
    kr, ki = jax.random.split(key)
    N, C, H, W = 2, 4, 16, 16
    xr = jax.random.normal(kr, (N, C, H, W), dtype=jnp.float32)
    xi = jax.random.normal(ki, (N, C, H, W), dtype=jnp.float32)
    x = jax.lax.complex(xr, xi)

    k = 2
    out = magnitude_average_pool(x, kernel_size=k)
    out = jax.block_until_ready(out)

    # Pure-JAX reference: complex average over non-overlapping k x k windows.
    ref = x.reshape(N, C, H // k, k, W // k, k).mean(axis=(3, 5))
    assert out.shape == (N, C, H // k, W // k)
    assert out.dtype == jnp.complex64
    assert jnp.allclose(out, ref, atol=1e-5, rtol=1e-5)
    print("KERNEL_OK")
</pallas_src>

<mosaic_0001>
module attributes {stable_mosaic.version = 11 : i64} {
  func.func @_pool_matmul_kernel(%arg0: i32, %arg1: memref<512x128xf32, #tpu.memory_space<vmem>>, %arg2: memref<8x512xf32, #tpu.memory_space<vmem>>, %arg3: memref<8x128xf32, #tpu.memory_space<vmem>>) attributes {dimension_semantics = [#tpu.dimension_semantics<parallel>], iteration_bounds = array<i64: 1>, scalar_prefetch = 0 : i64, scratch_operands = 0 : i64, tpu.core_type = #tpu.core_type<tc>, window_params = [{pipeline_mode = #tpu.pipeline_mode<synchronous>, transform_indices = @transform_0, window_bounds = array<i64: 512, 128>}, {transform_indices = @transform_1, window_bounds = array<i64: 8, 512>}, {transform_indices = @transform_2, window_bounds = array<i64: 8, 128>}]} {
    %c0 = arith.constant 0 : index
    %c0_0 = arith.constant 0 : index
    %0 = vector.load %arg2[%c0, %c0_0] : memref<8x512xf32, #tpu.memory_space<vmem>>, vector<8x512xf32>
    %c0_1 = arith.constant 0 : index
    %c0_2 = arith.constant 0 : index
    %1 = vector.load %arg1[%c0_1, %c0_2] : memref<512x128xf32, #tpu.memory_space<vmem>>, vector<512x128xf32>
    %cst = arith.constant dense<0.000000e+00> : vector<8x128xf32>
    %2 = tpu.matmul %0, %1, %cst {dimension_numbers = #tpu.dot_dimension_numbers<[1], [0], [0], [1], [0, 0, 1, 1], [], []>, precision = #tpu.contract_precision<fp32>} : vector<8x512xf32>, vector<512x128xf32>, vector<8x128xf32> -> vector<8x128xf32>
    %c0_3 = arith.constant 0 : index
    %c0_4 = arith.constant 0 : index
    %3 = vector.load %arg3[%c0_3, %c0_4] : memref<8x128xf32, #tpu.memory_space<vmem>>, vector<8x128xf32>
    tpu.vector_store %arg3[%c0_3, %c0_4], %2 {strides = array<i32>} : memref<8x128xf32, #tpu.memory_space<vmem>>, vector<8x128xf32>,
    return
  }
  func.func @transform_0(%arg0: i32) -> (i32, i32) {
    %c0_i32 = arith.constant 0 : i32
    %c0_i32_0 = arith.constant 0 : i32
    %c0_i32_1 = arith.constant 0 : i32
    return %c0_i32, %c0_i32_0 : i32, i32
  }
  func.func @transform_1(%arg0: i32) -> (i32, i32) {
    %c0_i32 = arith.constant 0 : i32
    %c0_i32_0 = arith.constant 0 : i32
    return %arg0, %c0_i32 : i32, i32
  }
  func.func @transform_2(%arg0: i32) -> (i32, i32) {
    %c0_i32 = arith.constant 0 : i32
    %c0_i32_0 = arith.constant 0 : i32
    return %arg0, %c0_i32 : i32, i32
  }
}

</mosaic_0001>

<bundles_post_ra>
// kernel: custom-call.1
= control target key start
LH: loop header
LB: loop body
LE: loop exit
PB: predicated region body
PF: predicated region fallthrough
CT: control target
= control target key end

     0   :  { %s59_s0 = inlined_call_operand.hbm [shape: c64[2,4,16,16], index: 0, kind: input, shape index: {}]   ;;  %s60_s1 = inlined_call_operand.vmem [shape: f32[2,4,16,16], index: 1, kind: output, shape index: {}]  }
   0x1   :  { %s2_s8 = scalar_lea.hbm %s59_s0, 2048 }
   0x2   :  { %3 = vsyncpa [#allocation0], 0  ;;  %s4_s11 = sshll.u32 %s60_s1, 4  ;;  %s34_s14 = scalar_lea.hbm %s59_s0, 4096  ;;  %s5_s11 = int_to_ptr.vmem [resolvable:$true] %s4_s11 }
   0x3   :  { %p11_p0 = scmp.ne.s32.totalorder %s2_s8, %s34_s14  ;;  %p13_p1 = scmp.lt.u32.totalorder %s2_s8, %s59_s0 }
   0x4   :  { %p14_p2 = scmp.lt.u32.totalorder %s34_s14, %s34_s14  ;;  %p16_p4 = scmp.lt.u32.totalorder %s34_s14, %s2_s8 }
   0x6   :  { %p15_p3 = por %p14_p2, %p13_p1 }
   0x8   :  { %p17_p5 = por %p16_p4, %p15_p3 }
   0xa   :  { %p18_p6 = pnand %p17_p5, %p11_p0 }
   0xc   :  { %21 = shalt.err (!%p18_p6)  }
   0xd   :  { %s22_s17 = scalar_lea.vmem %s5_s11, 2048  ;;  %p27_p8 = scmp.lt.s32.totalorder %s5_s11, %s5_s11 }
   0xe   :  { %p23_p7 = scmp.ne.s32.totalorder %s5_s11, %s22_s17  ;;  %p28_p9 = scmp.lt.s32.totalorder %s22_s17, %s22_s17 }
  0x10   :  { %p29_p10 = por %p28_p9, %p27_p8 }
  0x12   :  { %p30_p11 = pnand %p29_p10, %p23_p7 }
  0x14   :  { %33 = shalt.err (!%p30_p11)  }
  0x15   :  { %7 = dma.hbm_to_vmem [thread:$0]  %s2_s8, 2048, %s5_s11, [#allocation0] }
  0x16   :  { %35 = dma.done.wait [#allocation0], 2048  }
  0x17   :  { %36 = vsyncadd [#allocation0], 4294965248 }
  0x18   :  { %9 = vsyncpa [#allocation0], 1 }

// kernel: custom-call
= control target key start
LH: loop header
LB: loop body
LE: loop exit
PB: predicated region body
PF: predicated region fallthrough
CT: control target
= control target key end

     0   :  { %2 = vsyncpa [#allocation0], 0  ;;  %s61_s0 = inlined_call_operand.hbm [shape: c64[2,4,16,16], index: 0, kind: input, shape index: {}]   ;;  %s62_s1 = inlined_call_operand.vmem [shape: f32[2,4,16,16], index: 1, kind: output, shape index: {}]  }
   0x1   :  { %s3_s8 = sshll.u32 %s62_s1, 4  ;;  %s9_s11 = scalar_lea.hbm %s61_s0, 2048  ;;  %s4_s8 = int_to_ptr.vmem [resolvable:$true] %s3_s8 }
   0x2   :  { %p10_p0 = scmp.ne.s32.totalorder %s61_s0, %s9_s11  ;;  %s11_s16 = scalar_lea.hbm %s61_s0, 4096 }
   0x3   :  { %p12_p1 = scmp.lt.u32.totalorder %s11_s16, %s9_s11  ;;  %p13_p2 = scmp.lt.u32.totalorder %s9_s11, %s61_s0 }
   0x5   :  { %p14_p3 = por %p13_p2, %p12_p1 }
   0x7   :  { %p15_p4 = pnand %p14_p3, %p10_p0 }
   0x9   :  { %18 = shalt.err (!%p15_p4)  }
   0xa   :  { %s19_s1 = scalar_lea.vmem %s4_s8, 2048  ;;  %p24_p6 = scmp.lt.s32.totalorder %s4_s8, %s4_s8 }
   0xb   :  { %p20_p5 = scmp.ne.s32.totalorder %s4_s8, %s19_s1  ;;  %p25_p7 = scmp.lt.s32.totalorder %s19_s1, %s19_s1 }
   0xd   :  { %p26_p8 = por %p25_p7, %p24_p6 }
   0xf   :  { %p27_p9 = pnand %p26_p8, %p20_p5 }
  0x11   :  { %30 = shalt.err (!%p27_p9)  }
  0x12   :  { %6 = dma.hbm_to_vmem [thread:$0]  %s61_s0, 2048, %s4_s8, [#allocation0] }
  0x13   :  { %31 = dma.done.wait [#allocation0], 2048  }
  0x14   :  { %32 = vsyncadd [#allocation0], 4294965248 }
  0x15   :  { %8 = vsyncpa [#allocation0], 1 }

// kernel: custom-call.2
= control target key start
LH: loop header
LB: loop body
LE: loop exit
PB: predicated region body
PF: predicated region fallthrough
CT: control target
= control target key end

     0   :  { %s126_s0 = inlined_call_operand.vmem [shape: f32[2,4,8,8], index: 0, kind: input, shape index: {}]   ;;  %s127_s1 = inlined_call_operand.vmem [shape: f32[2,4,8,8], index: 1, kind: input, shape index: {}]   ;;  %s128_s2 = inlined_call_operand.hbm [shape: c64[2,4,8,8], index: 2, kind: output, shape index: {}]  }
   0x1   :  { %s87_s11 = scalar_lea.hbm %s128_s2, 1024 }
   0x2   :  { %4 = vsyncpa [#allocation0], 0  ;;  %s5_s14 = sshll.u32 %s126_s0, 4  ;;  %s6_s14 = int_to_ptr.vmem [resolvable:$true] %s5_s14 }
   0x3   :  { %s18_s15 = scalar_lea.vmem %s6_s14, 1024  ;;  %p23_p1 = scmp.lt.s32.totalorder %s6_s14, %s6_s14 }
   0x4   :  { %p19_p0 = scmp.ne.s32.totalorder %s6_s14, %s18_s15  ;;  %p24_p2 = scmp.lt.s32.totalorder %s18_s15, %s18_s15 }
   0x6   :  { %p25_p3 = por %p24_p2, %p23_p1 }
   0x8   :  { %p26_p4 = pnand %p25_p3, %p19_p0 }
   0xa   :  { %29 = shalt.err (!%p26_p4)  }
   0xb   :  { %p31_p5 = scmp.ne.s32.totalorder %s128_s2, %s87_s11  ;;  %s32_s0 = scalar_lea.hbm %s128_s2, 2048 }
   0xc   :  { %p33_p6 = scmp.lt.u32.totalorder %s32_s0, %s87_s11  ;;  %p34_p7 = scmp.lt.u32.totalorder %s87_s11, %s128_s2 }
   0xe   :  { %p35_p8 = por %p34_p7, %p33_p6 }
  0x10   :  { %p36_p9 = pnand %p35_p8, %p31_p5 }
  0x12   :  { %39 = shalt.err (!%p36_p9)  }
  0x13   :  { %8 = dma.vmem_to_hbm [thread:$0]  %s6_s14, 1024, %s128_s2, [#allocation0] }
  0x14   :  { %65 = dma.done.wait [#allocation0], 1024  }
  0x15   :  { %66 = vsyncadd [#allocation0], 4294966272 }
  0x16   :  { %10 = vsyncpa [#allocation0], 1 }
  0x17   :  { %11 = vsyncpa [#allocation1], 0  ;;  %s12_s28 = sshll.u32 %s127_s1, 4  ;;  %s13_s28 = int_to_ptr.vmem [resolvable:$true] %s12_s28 }
  0x18   :  { %s40_s29 = scalar_lea.vmem %s13_s28, 1024  ;;  %p45_p11 = scmp.lt.s32.totalorder %s13_s28, %s13_s28 }
  0x19   :  { %p41_p10 = scmp.ne.s32.totalorder %s13_s28, %s40_s29  ;;  %p46_p12 = scmp.lt.s32.totalorder %s40_s29, %s40_s29 }
  0x1b   :  { %p47_p13 = por %p46_p12, %p45_p11 }
  0x1d   :  { %p48_p0 = pnand %p47_p13, %p41_p10 }
  0x1f   :  { %51 = shalt.err (!%p48_p0)  }
  0x20   :  { %p53_p1 = scmp.ne.s32.totalorder %s87_s11, %s32_s0  ;;  %p56_p2 = scmp.lt.u32.totalorder %s32_s0, %s32_s0 }
  0x22   :  { %p57_p3 = por %p56_p2, %p34_p7 }
  0x24   :  { %p59_p4 = por %p57_p3, %p33_p6 }
  0x26   :  { %p60_p5 = pnand %p59_p4, %p53_p1 }
  0x28   :  { %63 = shalt.err (!%p60_p5)  }
  0x29   :  { %15 = dma.vmem_to_hbm [thread:$0]  %s13_s28, 1024, %s87_s11, [#allocation1] }
  0x2a   :  { %67 = dma.done.wait [#allocation1], 1024  }
  0x2b   :  { %68 = vsyncadd [#allocation1], 4294966272 }
  0x2c   :  { %17 = vsyncpa [#allocation1], 1 }

// kernel: _pool_impl.2
= control target key start
LH: loop header
LB: loop body
LE: loop exit
PB: predicated region body
PF: predicated region fallthrough
CT: control target
= control target key end

     0   :  { %s3665_s0 = inlined_call_operand.hbm [shape: f32[512,128], index: 0, kind: input, shape index: {}]   ;;  %s3666_s1 = inlined_call_operand.vmem [shape: f32[8,256], index: 1, kind: input, shape index: {}]   ;;  %s3667_s2 = inlined_call_operand.<no memory space> [shape: f32[], index: 2, kind: input, shape index: {}]   ;;  %s3668_s3 = inlined_call_operand.vmem [shape: f32[8,256], index: 3, kind: input, shape index: {}]   ;;  %s3669_s4 = inlined_call_operand.vmem [shape: f32[8,128], index: 4, kind: output, shape index: {}]  }
   0x1   :  { %v2735_v0 = vstv %s3667_s2 }
   0x2   :  { %3764 = vst [vmem:[#allocation16_spill] sm:$0xff] %v2735_v0 }
   0x3   :  { %11 = vsyncpa [#allocation13], 0  ;;  %s2704_s17 = smov [#allocation12]   ;;  %s2680_s21 = scalar_lea.hbm %s3665_s0, 8192 }
   0x4   :  { %s17_s18 = sshll.u32 %s2704_s17, 4  ;;  %p2681_p0 = scmp.ne.s32.totalorder %s3665_s0, %s2680_s21  ;;  %s18_s18 = int_to_ptr.vmem [resolvable:$true] %s17_s18 }
   0x5   :  { %p2684_p1 = scmp.lt.u32.totalorder %s2680_s21, %s3665_s0 }
   0x7   :  { %p2686_p2 = pnand %p2684_p1, %p2681_p0 }
   0x9   :  { %2689 = shalt.err (!%p2686_p2)
}
   0xa   :  { %s2690_s2 = scalar_lea.vmem %s18_s18, 8192  ;;  %p2695_p4 = scmp.lt.s32.totalorder %s18_s18, %s18_s18 }
   0xb   :  { %p2691_p3 = scmp.ne.s32.totalorder %s18_s18, %s2690_s2  ;;  %p2696_p5 = scmp.lt.s32.totalorder %s2690_s2, %s2690_s2 }
   0xd   :  { %p2697_p6 = por %p2696_p5, %p2695_p4 }
   0xf   :  { %p2698_p7 = pnand %p2697_p6, %p2691_p3 }
  0x11   :  { %2701 = shalt.err (!%p2698_p7)
}
  0x12   :  { %s2705_s26 = smov 128   ;;  %s2706_s27 = smov 8  }
  0x13   :  { %23 = dma.hbm_to_vmem [thread:$0]  %s3665_s0, 8192, %s18_s18, [#allocation13], %s2705_s26, %s2705_s26, %s2706_s27  }
  0x14   :  { %2702 = dma.done.wait [#allocation13], 8192  }
  0x15   :  { %2703 = vsyncadd [#allocation13], 4294959104  ;;  %v89_v1 = vld [vmem:[#allocation12 + $0x80] sm:$0xff]  ;;  %v90_v2 = vld [vmem:[#allocation12 + $0x88] sm:$0xff] }
  0x16   :  { %v73_v3 = vld [vmem:[#allocation12] sm:$0xff]  ;;  %v186_v4 = vand.u32 4294901760, %v89_v1  ;;  %v189_v5 = vand.u32 4294901760, %v90_v2  ;;  %v74_v6 = vld [vmem:[#allocation12 + $0x8] sm:$0xff]  ;;  %v91_v8 = vld [vmem:[#allocation12 + $0x90] sm:$0xff] }
  0x17   :  { %v138_v7 = vand.u32 4294901760, %v73_v3  ;;  %v92_v9 = vld [vmem:[#allocation12 + $0x98] sm:$0xff]  ;;  %v141_v10 = vand.u32 4294901760, %v74_v6  ;;  %v192_v11 = vand.u32 4294901760, %v91_v8  ;;  %v75_v13 = vld [vmem:[#allocation12 + $0x10] sm:$0xff]  ;;  %v93_v19 = vld [vmem:[#allocation12 + $0xa0] sm:$0xff] }
  0x18   :  { %v195_v12 = vand.u32 4294901760, %v92_v9  ;;  %v76_v14 = vld [vmem:[#allocation12 + $0x18] sm:$0xff]  ;;  %v2749_v15 = vpack.c.bf16 %v189_v5, %v186_v4  ;;  %v144_v17 = vand.u32 4294901760, %v75_v13  ;;  %v94_v20 = vld [vmem:[#allocation12 + $0xa8] sm:$0xff]  ;;  %v77_v24 = vld [vmem:[#allocation12 + $0x20] sm:$0xff]  ;;  %v198_v30 = vand.u32 4294901760, %v93_v19 }
  0x19   :  { %v2751_v16 = vsub.f32 %v73_v3, %v138_v7  ;;  %v147_v18 = vand.u32 4294901760, %v76_v14  ;;  %v2753_v21 = vpack.c.bf16 %v141_v10, %v138_v7  ;;  %v2755_v22 = vsub.f32 %v74_v6, %v141_v10  ;;  %v78_v25 = vld [vmem:[#allocation12 + $0x28] sm:$0xff]  ;;  %v95_v38 = vld [vmem:[#allocation12 + $0xb0] sm:$0xff]  ;;  %v96_v43 = vld [vmem:[#allocation12 + $0xb8] sm:$0xff] }
  0x1a   :  { %v2757_v23 = vpack.c.bf16 %v195_v12, %v192_v11  ;;  %2294 = vmatprep.subr.bf16.mxu0 %v2749_v15  ;;  %v2760_v26 = vsub.f32 %v91_v8, %v192_v11  ;;  %v2762_v27 = vsub.f32 %v92_v9, %v195_v12  ;;  %v2766_v29 = vsub.f32 %v75_v13, %v144_v17  ;;  %v79_v56 = vld [vmem:[#allocation12 + $0x30] sm:$0xff]  ;;  %v80_v57 = vld [vmem:[#allocation12 + $0x38] sm:$0xff]  ;;  %v97_v7 = vld [vmem:[#allocation12 + $0xc0] sm:$0xff] }
  0x1b   :  { %v2764_v28 = vpack.c.bf16 %v147_v18, %v144_v17  ;;  %2296 = vmatpush3.bf16.msra.mxu0 %v2753_v21  ;;  %v201_v31 = vand.u32 4294901760, %v94_v20  ;;  %v2769_v32 = vsub.f32 %v89_v1, %v186_v4  ;;  %v2771_v33 = vsub.f32 %v90_v2, %v189_v5  ;;  %v98_v8 = vld [vmem:[#allocation12 + $0xc8] sm:$0xff]  ;;  %v81_v13 = vld [vmem:[#allocation12 + $0x40] sm:$0xff] }
  0x1c   :  { %2298 = vmatprep.subr.bf16.mxu0 %v2757_v23  ;;  %v150_v34 = vand.u32 4294901760, %v77_v24  ;;  %v153_v35 = vand.u32 4294901760, %v78_v25  ;;  %v3685_v36 = vand.u32 4294901760, %v2751_v16  ;;  %v3683_v37 = vand.u32 4294901760, %v2755_v22 }
  0x1d   :  { %v2776_v39 = vsub.f32 %v76_v14, %v147_v18  ;;  %v2778_v40 = vpack.c.bf16 %v201_v31, %v198_v30  ;;  %v2780_v41 = vsub.f32 %v93_v19, %v198_v30  ;;  %v3688_v42 = vand.u32 4294901760, %v2769_v32 }
  0x1e   :  { %v2783_v44 = vsub.f32 %v94_v20, %v201_v31  ;;  %v3686_v45 = vand.u32 4294901760, %v2771_v33  ;;  %v2786_v46 = vpack.c.bf16 %v153_v35, %v150_v34  ;;  %v2788_v47 = vsub.f32 %v77_v24, %v150_v34  ;;  %v82_v31 = vld [vmem:[#allocation12 + $0x48] sm:$0xff] }
  0x1f   :  { %2300 = vmatpush3.bf16.msra.mxu0 %v2764_v28  ;;  %v365_v48 = vsub.f32 %v2769_v32, %v3688_v42  ;;  %v253_v49 = vsub.f32 %v2751_v16, %v3685_v36  ;;  %v260_v50 = vsub.f32 %v2755_v22, %v3683_v37  ;;  %v204_v51 = vand.u32 4294901760, %v95_v38 }
  0x20   :  { %2302 = vmatprep.subr.bf16.mxu0 %v2778_v40  ;;  %v372_v52 = vsub.f32 %v2771_v33, %v3686_v45  ;;  %v207_v53 = vand.u32 4294901760, %v96_v43  ;;  %v3681_v54 = vand.u32 4294901760, %v2760_v26  ;;  %v3680_v55 = vand.u32 4294901760, %v2762_v27 }
  0x21   :  { %v366_v58 = vand.u32 4294901760, %v365_v48  ;;  %v2806_v59 = vsub.f32 %v78_v25, %v153_v35  ;;  %v254_v60 = vand.u32 4294901760, %v253_v49  ;;  %v261_v61 = vand.u32 4294901760, %v260_v50 }
  0x22   :  { %v373_v62 = vand.u32 4294901760, %v372_v52  ;;  %v2808_v63 = vpack.c.bf16 %v207_v53, %v204_v51  ;;  %v2810_v1 = vsub.f32 %v95_v38, %v204_v51  ;;  %v379_v2 = vsub.f32 %v2760_v26, %v3681_v54  ;;  %v104_v54 = vld [vmem:[#allocation12 + $0xf8] sm:$0xff] }
  0x23   :  { %2304 = vmatpush3.bf16.msra.mxu0 %v2786_v46  ;;  %v2327_v3 = vpack.c.bf16 %v261_v61, %v254_v60  ;;  %v386_v4 = vsub.f32 %v2762_v27, %v3680_v55  ;;  %v156_v5 = vand.u32 4294901760, %v79_v56  ;;  %v159_v6 = vand.u32 4294901760, %v80_v57  ;;  %v99_v60 = vld [vmem:[#allocation12 + $0xd0] sm:$0xff]  ;;  %v100_v61 = vld [vmem:[#allocation12 + $0xd8] sm:$0xff] }
  0x24   :  { %v2325_v9 = vpack.c.bf16 %v373_v62, %v366_v58  ;;  %2306 = vmatprep.subr.bf16.mxu0 %v2808_v63  ;;  %v380_v10 = vand.u32 4294901760, %v379_v2  ;;  %v3678_v11 = vand.u32 4294901760, %v2766_v29  ;;  %v3676_v12 = vand.u32 4294901760, %v2776_v39  ;;  %v103_v55 = vld [vmem:[#allocation12 + $0xf0] sm:$0xff] }
  0x25   :  { %v2822_v14 = vsub.f32 %v96_v43, %v207_v53  ;;  %v387_v17 = vand.u32 4294901760, %v386_v4  ;;  %v2824_v18 = vpack.c.bf16 %v159_v6, %v156_v5  ;;  %v2826_v19 = vsub.f32 %v79_v56, %v156_v5  ;;  %v83_v4 = vld [vmem:[#allocation12 + $0x50] sm:$0xff] }
  0x26   :  { %2326 = vmatprep.subr.bf16.mxu1 %v2325_v9  ;;  %v267_v20 = vsub.f32 %v2766_v29, %v3678_v11  ;;  %v274_v24 = vsub.f32 %v2776_v39, %v3676_v12  ;;  %v210_v25 = vand.u32 4294901760, %v97_v7  ;;  %v213_v30 = vand.u32 4294901760, %v98_v8 }
  0x27   :  { %2328 = vmatpush3.bf16.msra.mxu1 %v2327_v3  ;;  %v2329_v34 = vpack.c.bf16 %v387_v17, %v380_v10  ;;  %2308 = vmatpush3.bf16.msra.mxu0 %v2824_v18  ;;  %v3675_v35 = vand.u32 4294901760, %v2780_v41  ;;  %v3673_v38 = vand.u32 4294901760, %v2783_v44  ;;  %v162_v43 = vand.u32 4294901760, %v81_v13 }
  0x28   :  { %v2837_v48 = vsub.f32 %v80_v57, %v159_v6  ;;  %v268_v49 = vand.u32 4294901760, %v267_v20  ;;  %v275_v50 = vand.u32 4294901760, %v274_v24  ;;  %v2839_v51 = vpack.c.bf16 %v213_v30, %v210_v25  ;;  %v84_v24 = vld [vmem:[#allocation12 + $0x58] sm:$0xff] }
  0x29   :  { %2330 = vmatprep.subr.bf16.mxu1 %v2329_v34  ;;  %v2841_v52 = vsub.f32 %v97_v7, %v210_v25  ;;  %v393_v53 = vsub.f32 %v2780_v41, %v3675_v35  ;;  %v400_v56 = vsub.f32 %v2783_v44, %v3673_v38  ;;  %v165_v58 = vand.u32 4294901760, %v82_v31 }
  0x2a   :  { %v2331_v57 = vpack.c.bf16 %v275_v50, %v268_v49  ;;  %2310 = vmatprep.subr.bf16.mxu0 %v2839_v51  ;;  %v2850_v62 = vsub.f32 %v98_v8, %v213_v30  ;;  %v3671_v2 = vand.u32 4294901760, %v2788_v47  ;;  %v3670_v3 = vand.u32 4294901760, %v2806_v59 }
  0x2b   :  { %v394_v5 = vand.u32 4294901760, %v393_v53  ;;  %v401_v6 = vand.u32 4294901760, %v400_v56  ;;  %v2854_v7 = vpack.c.bf16 %v165_v58, %v162_v43  ;;  %v2856_v9 = vsub.f32 %v81_v13, %v162_v43 }
  0x2c   :  { %2332 = vmatpush3.bf16.msra.mxu1 %v2331_v57  ;;  %v281_v10 = vsub.f32 %v2788_v47, %v3671_v2  ;;  %v288_v8 = vsub.f32 %v2806_v59, %v3670_v3  ;;  %v216_v17 = vand.u32 4294901760, %v99_v60  ;;  %v219_v20 = vand.u32 4294901760, %v100_v61  ;;  %v101_v3 = vld [vmem:[#allocation12 + $0xe0] sm:$0xff]  ;;  %v102_v2 = vld [vmem:[#allocation12 + $0xe8] sm:$0xff] }
  0x2d   :  { %v2333_v25 = vpack.c.bf16 %v401_v6, %v394_v5  ;;  %2312 = vmatpush3.bf16.msra.mxu0 %v2854_v7  ;;  %v3672_v30 = vand.u32 4294901760, %v2810_v1  ;;  %v3674_v13 = vand.u32 4294901760, %v2822_v14  ;;  %v168_v34 = vand.u32 4294901760, %v83_v4 }
  0x2e   :  { %v2867_v43 = vsub.f32 %v82_v31, %v165_v58  ;;  %v282_v49 = vand.u32 4294901760, %v281_v10  ;;  %v289_v50 = vand.u32 4294901760, %v288_v8  ;;  %v2869_v53 = vpack.c.bf16 %v219_v20, %v216_v17  ;;  %v85_v8 = vld [vmem:[#allocation12 + $0x60] sm:$0xff] }
  0x2f   :  { %2334 = vmatprep.subr.bf16.mxu1 %v2333_v25  ;;  %v2871_v56 = vsub.f32 %v99_v60, %v216_v17  ;;  %v407_v57 = vsub.f32 %v2810_v1, %v3672_v30  ;;  %v414_v5 = vsub.f32 %v2822_v14, %v3674_v13  ;;  %v171_v6 = vand.u32 4294901760, %v84_v24  ;;  %v86_v13 = vld [vmem:[#allocation12 + $0x68] sm:$0xff] }
  0x30   :  { %v2335_v31 = vpack.c.bf16 %v289_v50, %v282_v49  ;;  %2314 = vmatprep.subr.bf16.mxu0 %v2869_v53  ;;  %v2880_v58 = vsub.f32 %v100_v61, %v219_v20  ;;  %v3677_v10 = vand.u32 4294901760, %v2826_v19  ;;  %v3679_v60 = vand.u32 4294901760, %v2837_v48 }
  0x31   :  { %v408_v17 = vand.u32 4294901760, %v407_v57  ;;  %v415_v25 = vand.u32 4294901760, %v414_v5  ;;  %v2884_v30 = vpack.c.bf16 %v171_v6, %v168_v34  ;;  %v2886_v38 = vsub.f32 %v83_v4, %v168_v34 }
  0x32   :  { %2336 = vmatpush3.bf16.msra.mxu1 %v2335_v31  ;;  %v295_v49 = vsub.f32 %v2826_v19, %v3677_v10  ;;  %v302_v61 = vsub.f32 %v2837_v48, %v3679_v60  ;;  %v222_v20 = vand.u32 4294901760, %v101_v3  ;;  %v225_v50 = vand.u32 4294901760, %v102_v2 }
  0x33   :  { %3765 = vst [vmem:[#allocation17_spill] sm:$0xff] %v2884_v30  ;;  %v2337_v35 = vpack.c.bf16 %v415_v25, %v408_v17  ;;  %2316 = vmatpush3.bf16.msra.mxu0 %v2884_v30  ;;  %v3682_v57 = vand.u32 4294901760, %v2841_v52  ;;  %v3684_v4 = vand.u32 4294901760, %v2850_v62  ;;  %v174_v34 = vand.u32 4294901760, %v85_v8 }
  0x34   :  { %v2897_v5 = vsub.f32 %v84_v24, %v171_v6  ;;  %v296_v31 = vand.u32 4294901760, %v295_v49  ;;  %v303_v12 = vand.u32 4294901760, %v302_v61  ;;  %v2899_v10 = vpack.c.bf16 %v225_v50, %v222_v20  ;;  %v87_v49 = vld [vmem:[#allocation12 + $0x70] sm:$0xff] }
  0x35   :  { %2338 = vmatprep.subr.bf16.mxu1 %v2337_v35  ;;  %v2901_v11 = vsub.f32 %v101_v3, %v222_v20  ;;  %v421_v17 = vsub.f32 %v2841_v52, %v3682_v57  ;;  %v428_v25 = vsub.f32 %v2850_v62, %v3684_v4  ;;  %v177_v60 = vand.u32 4294901760, %v86_v13  ;;  %v88_v4 = vld [vmem:[#allocation12 + $0x78] sm:$0xff] }
  0x36   :  { %3766 = vst [vmem:[#allocation18_spill] sm:$0xff] %v2899_v10  ;;  %v2339_v24 = vpack.c.bf16 %v303_v12, %v296_v31  ;;  %2318 = vmatprep.subr.bf16.mxu0 %v2899_v10  ;;  %v2910_v6 = vsub.f32 %v102_v2, %v225_v50  ;;  %v3687_v35 = vand.u32 4294901760, %v2856_v9  ;;  %v3689_v3 = vand.u32 4294901760, %v2867_v43 }
  0x37   :  { %v422_v61 = vand.u32 4294901760, %v421_v17  ;;  %v429_v20 = vand.u32 4294901760, %v428_v25  ;;  %v2914_v57 = vpack.c.bf16 %v177_v60, %v174_v34  ;;  %v2916_v37 = vsub.f32 %v85_v8, %v174_v34 }
  0x38   :  { %2340 = vmatpush3.bf16.msra.mxu1 %v2339_v24  ;;  %v309_v12 = vsub.f32 %v2856_v9, %v3687_v35  ;;  %v316_v2 = vsub.f32 %v2867_v43, %v3689_v3  ;;  %v228_v50 = vand.u32 4294901760, %v103_v55  ;;  %v231_v31 = vand.u32 4294901760, %v104_v54 }
  0x39   :  { %3767 = vst [vmem:[#allocation19_spill] sm:$0xff] %v2914_v57  ;;  %v2341_v36 = vpack.c.bf16 %v429_v20, %v422_v61  ;;  %2320 = vmatpush3.bf16.msra.mxu0 %v2914_v57  ;;  %v3691_v17 = vand.u32 4294901760, %v2871_v56  ;;  %v3690_v8 = vand.u32 4294901760, %v2880_v58  ;;  %v180_v34 = vand.u32 4294901760, %v87_v49 }
  0x3a   :  { %v2927_v25 = vsub.f32 %v86_v13, %v177_v60  ;;  %v310_v24 = vand.u32 4294901760, %v309_v12  ;;  %v317_v45 = vand.u32 4294901760, %v316_v2  ;;  %v2929_v35 = vpack.c.bf16 %v231_v31, %v228_v50  ;;  %v1869_v13 = vld [vmem:[%s3668_s3 + $0x8] sm:$0xff]  ;;  %v34_v2 = vld [vmem:[%s3668_s3] sm:$0xff] }
  0x3b   :  { %2342 = vmatprep.subr.bf16.mxu1 %v2341_v36  ;;  %v2931_v42 = vsub.f32 %v103_v55, %v228_v50  ;;  %v435_v61 = vsub.f32 %v2871_v56, %v3691_v17  ;;  %v442_v20 = vsub.f32 %v2880_v58, %v3690_v8  ;;  %v183_v3 = vand.u32 4294901760, %v88_v4 }
  0x3c   :  { %3768 = vst [vmem:[#allocation20_spill] sm:$0xff] %v2929_v35  ;;  %v2343_v60 = vpack.c.bf16 %v317_v45, %v310_v24  ;;  %2322 = vmatprep.subr.bf16.mxu0 %v2929_v35  ;;  %v2943_v12 = vsub.f32 %v104_v54, %v231_v31  ;;  %v3696_v36 = vand.u32 4294901760, %v2886_v38  ;;  %v3697_v55 = vand.u32 4294901760, %v2897_v5 }
  0x3d   :  { %v436_v50 = vand.u32 4294901760, %v435_v61  ;;  %v443_v8 = vand.u32 4294901760, %v442_v20  ;;  %v2950_v17 = vpack.c.bf16 %v183_v3, %v180_v34  ;;  %v2952_v57 = vsub.f32 %v87_v49, %v180_v34 }
  0x3e   :  { %2344 = vmatpush3.bf16.msra.mxu1 %v2343_v60  ;;  %v323_v45 = vsub.f32 %v2886_v38, %v3696_v36  ;;  %v330_v54 = vsub.f32 %v2897_v5, %v3697_v55  ;;  %v46_v31 = vmax.f32 %v1869_v13, %v2735_v0  ;;  %v3702_v24 = vand.u32 4294901760, %v2901_v11 }
  0x3f   :  { %3769 = vst [vmem:[#allocation21_spill] sm:$0xff] %v2950_v17  ;;  %v2345_v35 = vpack.c.bf16 %v443_v8, %v436_v50  ;;  %2324 = vmatpush3.bf16.msra.mxu0 %v2950_v17  ;;  %v3703_v61 = vand.u32 4294901760, %v2910_v6  ;;  %v2357_v49 = vpack.c.bf16 %v2771_v33, %v2769_v32  ;;  %v37_v34 = vmax.f32 %v34_v2, %v2735_v0 }
  0x40   :  { %v324_v20 = vand.u32 4294901760, %v323_v45  ;;  %v331_v60 = vand.u32 4294901760, %v330_v54  ;;  %v2967_v36 = vand.u32 4294901760, %v46_v31  ;;  %v449_v13 = vsub.f32 %v2901_v11, %v3702_v24 }
  0x41   :  { %2346 = vmatprep.subr.bf16.mxu1 %v2345_v35  ;;  %v456_v8 = vsub.f32 %v2910_v6, %v3703_v61  ;;  %2358 = vmatprep.subr.bf16.mxu0 %v2357_v49  ;;  %v2975_v50 = vand.u32 4294901760, %v37_v34  ;;  %v3704_v55 = vand.u32 4294901760, %v2916_v37  ;;  %v3705_v2 = vand.u32 4294901760, %v2927_v25 }
  0x42   :  { %3770 = vst [vmem:[#allocation22_spill] sm:$0xff] %v2967_v36  ;;  %v2979_v45 = vsub.f32 %v88_v4, %v183_v3  ;;  %v2347_v54 = vpack.c.bf16 %v331_v60, %v324_v20  ;;  %v2982_v0 = vsub.f32 %v46_v31, %v2967_v36  ;;  %v450_v17 = vand.u32 4294901760, %v449_v13  ;;  %474 = vmatprep.mubr.f32.mxu1 %v2967_v36 }
  0x43   :  { %v457_v35 = vand.u32 4294901760, %v456_v8  ;;  %v2986_v24 = vsub.f32 %v37_v34, %v2975_v50  ;;  %v337_v49 = vsub.f32 %v2916_v37, %v3704_v55  ;;  %v344_v4 = vsub.f32 %v2927_v25, %v3705_v2 }
  0x44   :  { %2348 = vmatpush3.bf16.msra.mxu1 %v2347_v54  ;;  %v235_v3 = vand.u32 4294901760, %v2982_v0  ;;  %v3710_v31 = vand.u32 4294901760, %v2931_v42  ;;  %v3711_v20 = vand.u32 4294901760, %v2943_v12  ;;  %v350_v2 = vand.u32 4294901760, %v2952_v57 }
  0x45   :  { %v2349_v60 = vpack.c.bf16 %v457_v35, %v450_v17  ;;  %v3714_v13 = vand.u32 4294901760, %v2986_v24  ;;  %v338_v34 = vand.u32 4294901760, %v337_v49  ;;  %v345_v8 = vand.u32 4294901760, %v344_v4 }
  0x46   :  { %v236_v61 = vsub.f32 %v2982_v0, %v235_v3  ;;  %v463_v55 = vsub.f32 %v2931_v42, %v3710_v31  ;;  %v470_v54 = vsub.f32 %v2943_v12, %v3711_v20  ;;  %v2359_v49 = vpack.c.bf16 %v2755_v22, %v2751_v16 }
  0x47   :  { %2350 = vmatprep.subr.bf16.mxu1 %v2349_v60  ;;  %v242_v17 = vsub.f32 %v2986_v24, %v3714_v13  ;;  %v2351_v35 = vpack.c.bf16 %v345_v8, %v338_v34  ;;  %v357_v4 = vand.u32 4294901760, %v2979_v45  ;;  %v351_v20 = vsub.f32 %v2952_v57, %v350_v2 }
  0x48   :  { %v237_v36 = vand.u32 4294901760, %v236_v61  ;;  %v464_v10 = vand.u32 4294901760, %v463_v55  ;;  %v471_v31 = vand.u32 4294901760, %v470_v54  ;;  %v2361_v60 = vpack.c.bf16 %v2762_v27, %v2760_v26 }
  0x49   :  { %v243_v30 = vand.u32 4294901760, %v242_v17  ;;  %2352 = vmatpush3.bf16.msra.mxu1 %v2351_v35  ;;  %v358_v34 = vsub.f32 %v2979_v45, %v357_v4  ;;  %v352_v13 = vand.u32 4294901760, %v351_v20  ;;  %v2363_v55 = vpack.c.bf16 %v2776_v39, %v2766_v29 }
  0x4a   :  { %238 = vmatprep.mubr.f32.mxu0 %v237_v36  ;;  %v2353_v8 = vpack.c.bf16 %v471_v31, %v464_v10  ;;  %v2365_v17 = vpack.c.bf16 %v2783_v44, %v2780_v41  ;;  %v2367_v35 = vpack.c.bf16 %v2806_v59, %v2788_v47  ;;  %v3771_v10 = vand.u32 4294901760, %v2769_v32 }
  0x4b   :  { %244 = vmatmul.mubr.f32.vlgmr.msra.gmra.mrb[0].mxu0 %v243_v30  ;;  %v359_v61 = vand.u32 4294901760, %v358_v34  ;;  %v3772_v30 = vand.u32 4294901760, %v2771_v33  ;;  %v3773_v31 = vand.u32 4294901760, %v2751_v16  ;;  %v3774_v20 = vand.u32 4294901760, %v2755_v22 }
  0x4c   :  { %2360 = vmatpush3.bf16.msra.mxu0 %v2359_v49  ;;  %2354 = vmatprep.subr.bf16.mxu1 %v2353_v8  ;;  %v3777_v8 = vand.u32 4294901760, %v2766_v29  ;;  %v3779_v32 = vand.u32 4294901760, %v2780_v41  ;;  %v3780_v33 = vand.u32 4294901760, %v2783_v44  ;;  %v3781_v22 = vand.u32 4294901760, %v2788_v47 }
  0x4d   :  { %2362 = vmatprep.subr.bf16.mxu0 %v2361_v60  ;;  %v2355_v54 = vpack.c.bf16 %v359_v61, %v352_v13  ;;  %611 = vmatprep.mubr.f32.mxu0 %v2982_v0  ;;  %v2421_v36 = vpack.c.bf16 %v3772_v30, %v3771_v10  ;;  %v2423_v49 = vpack.c.bf16 %v3774_v20, %v3773_v31  ;;  %v3775_v13 = vand.u32 4294901760, %v2760_v26 }
  0x4e   :  { %v3776_v60 = vand.u32 4294901760, %v2762_v27  ;;  %v3778_v61 = vand.u32 4294901760, %v2776_v39  ;;  %v3049_v16 = vpack.c.bf16 %v3780_v33, %v3779_v32  ;;  %v3782_v26 = vand.u32 4294901760, %v2806_v59 }
  0x4f   :  { %2356 = vmatpush3.bf16.msra.mxu1 %v2355_v54  ;;  %v3783_v27 = vand.u32 4294901760, %v2810_v1  ;;  %v3784_v29 = vand.u32 4294901760, %v2822_v14  ;;  %v3785_v54 = vand.u32 4294901760, %v2826_v19  ;;  %v3786_v41 = vand.u32 4294901760, %v2837_v48 }
  0x50   :  { %v2425_v34 = vpack.c.bf16 %v3776_v60, %v3775_v13  ;;  %v3043_v0 = vpack.c.bf16 %v3778_v61, %v3777_v8  ;;  %v3055_v10 = vpack.c.bf16 %v3782_v26, %v3781_v22  ;;  %2364 = vmatpush3.bf16.msra.mxu0 %v2363_v55  ;;  %2390 = vmatprep.subr.bf16.mxu1 %v2749_v15  ;;  %v3787_v44 = vand.u32 4294901760, %v2841_v52 }
  0x51   :  { %v3061_v39 = vpack.c.bf16 %v3784_v29, %v3783_v27  ;;  %v3067_v30 = vpack.c.bf16 %v3786_v41, %v3785_v54  ;;  %v3788_v47 = vand.u32 4294901760, %v2850_v62  ;;  %v3789_v31 = vand.u32 4294901760, %v2856_v9  ;;  %2366 = vmatprep.subr.bf16.mxu0 %v2365_v17  ;;  %v3801_v54 = vld [vmem:[#allocation22_spill] sm:$0xff] }
  0x52   :  { %v3790_v20 = vand.u32 4294901760, %v2867_v43  ;;  %v3791_v60 = vand.u32 4294901760, %v2871_v56  ;;  %v3792_v8 = vand.u32 4294901760, %v2880_v58  ;;  %v2369_v55 = vpack.c.bf16 %v2822_v14, %v2810_v1  ;;  %476 = vmatmul.mubr.f32.vlgmr.msra.gmra.mrb[0].mxu1 %v2975_v50 }
  0x53   :  { %v3074_v59 = vpack.c.bf16 %v3788_v47, %v3787_v44  ;;  %v3793_v32 = vand.u32 4294901760, %v2886_v38  ;;  %v3794_v33 = vand.u32 4294901760, %v2897_v5  ;;  %v3795_v26 = vand.u32 4294901760, %v2916_v37  ;;  %2392 = vmatpush3.bf16.msra.mxu1 %v2753_v21  ;;  %718 = vmatprep.mubr.f32.mxu1 %v235_v3  ;;  %v3802_v47 = vld [vmem:[#allocation21_spill] sm:$0xff] }
  0x54   :  { %v3080_v13 = vpack.c.bf16 %v3790_v20, %v3789_v31  ;;  %v3086_v61 = vpack.c.bf16 %v3792_v8, %v3791_v60  ;;  %v3796_v27 = vand.u32 4294901760, %v2927_v25  ;;  %2368 = vmatpush3.bf16.msra.mxu0 %v2367_v35  ;;  %2394 = vmatprep.subr.bf16.mxu1 %v2757_v23  ;;  %v2371_v1 = vpack.c.bf16 %v2837_v48, %v2826_v19  ;;  %v106_v35 = vld [vmem:[#allocation12 + $0x108] sm:$0xff]  ;;  %v123_v20 = vld [vmem:[#allocation12 + $0x190] sm:$0xff]  ;;  %v124_v60 = vld [vmem:[#allocation12 + $0x198] sm:$0xff] }
  0x55   :  { %v3094_v22 = vpack.c.bf16 %v3794_v33, %v3793_v32  ;;  %2370 = vmatprep.subr.bf16.mxu0 %v2369_v55  ;;  %v2373_v14 = vpack.c.bf16 %v2850_v62, %v2841_v52  ;;  %v2375_v17 = vpack.c.bf16 %v2867_v43, %v2856_v9  ;;  %v2377_v3 = vpack.c.bf16 %v2880_v58, %v2871_v56  ;;  %v3797_v9 = vld [vmem:[#allocation17_spill] sm:$0xff]  ;;  %v3798_v43 = vld [vmem:[#allocation18_spill] sm:$0xff]  ;;  %v3799_v58 = vld [vmem:[#allocation19_spill] sm:$0xff] }
  0x56   :  { %v3100_v29 = vpack.c.bf16 %v3796_v27, %v3795_v26  ;;  %v2379_v19 = vpack.c.bf16 %v2897_v5, %v2886_v38  ;;  %v2381_v48 = vpack.c.bf16 %v2910_v6, %v2901_v11  ;;  %v2383_v52 = vpack.c.bf16 %v2927_v25, %v2916_v37  ;;  %v121_v37 = vld [vmem:[#allocation12 + $0x180] sm:$0xff]  ;;  %v122_v56 = vld [vmem:[#allocation12 + $0x188] sm:$0xff]  ;;  %v3800_v5 = vld [vmem:[#allocation20_spill] sm:$0xff] }
  0x57   :  { %2396 = vmatpush3.bf16.msra.mxu1 %v2764_v28  ;;  %v2385_v62 = vpack.c.bf16 %v2943_v12, %v2931_v42  ;;  %v2387_v38 = vpack.c.bf16 %v2979_v45, %v2952_v57  ;;  %v105_v25 = vld [vmem:[#allocation12 + $0x100] sm:$0xff]  ;;  %v1048_v41 = vand.u32 4294901760, %v121_v37  ;;  %v1051_v44 = vand.u32 4294901760, %v122_v56  ;;  %v108_v8 = vld [vmem:[#allocation12 + $0x118] sm:$0xff] }
  0x58   :  { %2372 = vmatpush3.bf16.msra.mxu0 %v2371_v1  ;;  %2398 = vmatprep.subr.bf16.mxu1 %v2778_v40  ;;  %v1000_v31 = vand.u32 4294901760, %v105_v25  ;;  %v3803_v32 = vand.u32 4294901760, %v2986_v24  ;;  %v1054_v33 = vand.u32 4294901760, %v123_v20  ;;  %v1057_v26 = vand.u32 4294901760, %v124_v60  ;;  %v125_v27 = vld [vmem:[#allocation12 + $0x1a0] sm:$0xff]  ;;  %v126_v1 = vld [vmem:[#allocation12 + $0x1a8] sm:$0xff] }
  0x59   :  { %2374 = vmatprep.subr.bf16.mxu0 %v2373_v14  ;;  %v3141_v55 = vsub.f32 %v121_v37, %v1048_v41 }
  0x5a   :  { %v3180_v37 = vsub.f32 %v123_v20, %v1054_v33  ;;  %v3182_v57 = vsub.f32 %v124_v60, %v1057_v26  ;;  %v3188_v45 = vpack.c.bf16 %v1057_v26, %v1054_v33  ;;  %v3810_v20 = vld [vmem:[#allocation16_spill] sm:$0xff] }
  0x5b   :  { %2400 = vmatpush3.bf16.msra.mxu1 %v2786_v46 }
  0x5c   :  { %2376 = vmatpush3.bf16.msra.mxu0 %v2375_v17  ;;  %2402 = vmatprep.subr.bf16.mxu1 %v2808_v63  ;;  %v1009_v17 = vand.u32 4294901760, %v108_v8  ;;  %3809 = vst [vmem:[#allocation18_spill] sm:$0xff] %v3188_v45 }
  0x5d   :  { %2378 = vmatprep.subr.bf16.mxu0 %v2377_v3 }
  0x5f   :  { %2404 = vmatpush3.bf16.msra.mxu1 %v2824_v18 }
  0x60   :  { %2380 = vmatpush3.bf16.msra.mxu0 %v2379_v19  ;;  %2406 = vmatprep.subr.bf16.mxu1 %v2839_v51  ;;  %v3807_v19 = vand.u32 4294901760, %v2943_v12 }
  0x61   :  { %2382 = vmatprep.subr.bf16.mxu0 %v2381_v48 }
  0x63   :  { %2408 = vmatpush3.bf16.msra.mxu1 %v2854_v7 }
  0x64   :  { %2384 = vmatpush3.bf16.msra.mxu0 %v2383_v52  ;;  %2410 = vmatprep.subr.bf16.mxu1 %v2869_v53  ;;  %v3171_v52 = vpack.c.bf16 %v357_v4, %v350_v2  ;;  %v1872_v2 = vld [vmem:[%s3666_s1 + $0x8] sm:$0xff] }
  0x65   :  { %2386 = vmatprep.subr.bf16.mxu0 %v2385_v62  ;;  %v109_v62 = vld [vmem:[#allocation12 + $0x120] sm:$0xff] }
  0x67   :  { %2412 = vmatpush3.bf16.msra.mxu1 %v3797_v9 }
  0x68   :  { %2388 = vmatpush3.bf16.msra.mxu0 %v2387_v38  ;;  %2414 = vmatprep.subr.bf16.mxu1 %v3798_v43  ;;  %v3176_v38 = vpack.c.bf16 %v1051_v44, %v1048_v41  ;;  %v3198_v41 = vsub.f32 %v108_v8, %v1009_v17  ;;  %v3715_v8 = vand.u32 4294901760, %v3180_v37 }
  0x69   :  { %2422 = vmatprep.subr.bf16.mxu0 %v2421_v36  ;;  %v1003_v36 = vand.u32 4294901760, %v106_v35 }
  0x6b   :  { %614 = vmatmul.mubr.f32.vlgmr.msra.gmra.mrb[2].mxu0 %v2986_v24  ;;  %2416 = vmatpush3.bf16.msra.mxu1 %v3799_v58  ;;  %v3804_v24 = vand.u32 4294901760, %v2901_v11  ;;  %v1063_v11 = vand.u32 4294901760, %v126_v1  ;;  %v3178_v12 = vpack.c.bf16 %v1003_v36, %v1000_v31 }
  0x6c   :  { %2424 = vmatpush3.bf16.msra.mxu0 %v2423_v49  ;;  %2418 = vmatprep.subr.bf16.mxu1 %v3800_v5  ;;  %v107_v49 = vld [vmem:[#allocation12 + $0x110] sm:$0xff] }
  0x6d   :  { %2426 = vmatprep.subr.bf16.mxu0 %v2425_v34  ;;  %888 = vmatprep.mubr.f32.mxu0 %v3801_v54  ;;  %v3143_v34 = vsub.f32 %v122_v56, %v1051_v44  ;;  %v1006_v14 = vand.u32 4294901760, %v107_v49  ;;  %3808 = vst [vmem:[#allocation17_spill] sm:$0xff] %v3178_v12  ;;  %v1012_v44 = vand.u32 4294901760, %v109_v62 }
  0x6f   :  { %2420 = vmatpush3.bf16.msra.mxu1 %v3802_v47  ;;  %v3190_v4 = vpack.c.bf16 %v1009_v17, %v1006_v14  ;;  %v3225_v17 = vsub.f32 %v126_v1, %v1063_v11 }
  0x70   :  { %2428 = vmatpush3.bf16.msra.mxu0 %v3043_v0  ;;  %2454 = vmatprep.subr.bf16.mxu1 %v2749_v15  ;;  %v3148_v0 = vsub.f32 %v105_v25, %v1000_v31  ;;  %v3150_v15 = vsub.f32 %v106_v35, %v1003_v36  ;;  %v127_v25 = vld [vmem:[#allocation12 + $0x1b0] sm:$0xff]  ;;  %v128_v35 = vld [vmem:[#allocation12 + $0x1b8] sm:$0xff] }
  0x71   :  { %2430 = vmatprep.subr.bf16.mxu0 %v3049_v16  ;;  %v3805_v16 = vand.u32 4294901760, %v2910_v6  ;;  %v3725_v6 = vand.u32 4294901760, %v3141_v55  ;;  %v1066_v60 = vand.u32 4294901760, %v127_v25 }
  0x72   :  { %722 = vmatmul.mubr.f32.vlgmr.msra.gmra.mrb[2].mxu1 %v3803_v32  ;;  %v3717_v56 = vand.u32 4294901760, %v3150_v15  ;;  %v3716_v32 = vand.u32 4294901760, %v3182_v57 }
  0x73   :  { %2456 = vmatpush3.bf16.msra.mxu1 %v2753_v21  ;;  %992 = vmatprep.mubr.f32.mxu1 %v3801_v54  ;;  %v3159_v3 = vpack.c.bf16 %v3805_v16, %v3804_v24  ;;  %v3806_v21 = vand.u32 4294901760, %v2931_v42  ;;  %v110_v42 = vld [vmem:[#allocation12 + $0x128] sm:$0xff]  ;;  %v3196_v54 = vsub.f32 %v107_v49, %v1006_v14  ;;  %v1227_v36 = vsub.f32 %v3141_v55, %v3725_v6 }
  0x74   :  { %2432 = vmatpush3.bf16.msra.mxu0 %v3055_v10  ;;  %2458 = vmatprep.subr.bf16.mxu1 %v2757_v23  ;;  %v1060_v23 = vand.u32 4294901760, %v125_v27  ;;  %v3721_v10 = vand.u32 4294901760, %v3143_v34  ;;  %v1069_v49 = vand.u32 4294901760, %v128_v35  ;;  %v1122_v26 = vsub.f32 %v3150_v15, %v3717_v56  ;;  %v113_v56 = vld [vmem:[#allocation12 + $0x140] sm:$0xff] }
  0x75   :  { %v3165_v48 = vpack.c.bf16 %v3807_v19, %v3806_v21  ;;  %2434 = vmatprep.subr.bf16.mxu0 %v3061_v39  ;;  %v3720_v39 = vand.u32 4294901760, %v3148_v0  ;;  %v3719_v16 = vand.u32 4294901760, %v3198_v41  ;;  %v1228_v21 = vand.u32 4294901760, %v1227_v36 }
  0x76   :  { %v3201_v31 = vpack.c.bf16 %v1063_v11, %v1060_v23  ;;  %v3239_v1 = vpack.c.bf16 %v1069_v49, %v1066_v60  ;;  %v1241_v11 = vsub.f32 %v3180_v37, %v3715_v8  ;;  %v3248_v36 = vsub.f32 %v127_v25, %v1066_v60 }
  0x77   :  { %2460 = vmatpush3.bf16.msra.mxu1 %v2764_v28  ;;  %v1015_v28 = vand.u32 4294901760, %v110_v42  ;;  %v1115_v33 = vsub.f32 %v3148_v0, %v3720_v39 }
  0x78   :  { %2436 = vmatpush3.bf16.msra.mxu0 %v3067_v30  ;;  %2462 = vmatprep.subr.bf16.mxu1 %v2778_v40  ;;  %v1234_v30 = vsub.f32 %v3143_v34, %v3721_v10  ;;  %v64_v40 = vmax.f32 %v3810_v20, %v1872_v2  ;;  %v112_v2 = vld [vmem:[#allocation12 + $0x138] sm:$0xff]  ;;  %3813 = vst [vmem:[#allocation22_spill] sm:$0xff] %v3239_v1  ;;  %v114_v10 = vld [vmem:[#allocation12 + $0x148] sm:$0xff] }
  0x79   :  { %2438 = vmatprep.subr.bf16.mxu0 %v3074_v59  ;;  %v3213_v59 = vsub.f32 %v125_v27, %v1060_v23  ;;  %v3227_v24 = vpack.c.bf16 %v1015_v28, %v1012_v44  ;;  %v3718_v27 = vand.u32 4294901760, %v3196_v54  ;;  %v3232_v23 = vsub.f32 %v109_v62, %v1012_v44 }
  0x7a   :  { %v3221_v14 = vand.u32 4294901760, %v64_v40  ;;  %v1235_v19 = vand.u32 4294901760, %v1234_v30  ;;  %v1116_v62 = vand.u32 4294901760, %v1115_v33  ;;  %v1123_v44 = vand.u32 4294901760, %v1122_v26 }
  0x7b   :  { %2464 = vmatpush3.bf16.msra.mxu1 %v2786_v46  ;;  %3812 = vst [vmem:[#allocation20_spill] sm:$0xff] %v3227_v24  ;;  %v111_v46 = vld [vmem:[#allocation12 + $0x130] sm:$0xff]  ;;  %v1021_v8 = vand.u32 4294901760, %v112_v2  ;;  %v3723_v60 = vand.u32 4294901760, %v3213_v59 }
  0x7c   :  { %3811 = vst [vmem:[#allocation19_spill] sm:$0xff] %v3221_v14  ;;  %2440 = vmatpush3.bf16.msra.mxu0 %v3080_v13  ;;  %2466 = vmatprep.subr.bf16.mxu1 %v2808_v63  ;;  %v3235_v13 = vsub.f32 %v64_v40, %v3221_v14  ;;  %v3237_v63 = vsub.f32 %v110_v42, %v1015_v28  ;;  %v1018_v30 = vand.u32 4294901760, %v111_v46  ;;  %v129_v40 = vld [vmem:[#allocation12 + $0x1c0] sm:$0xff]  ;;  %v130_v42 = vld [vmem:[#allocation12 + $0x1c8] sm:$0xff] }
  0x7d   :  { %2442 = vmatprep.subr.bf16.mxu0 %v3086_v61  ;;  %v1248_v61 = vsub.f32 %v3182_v57, %v3716_v32  ;;  %v3252_v28 = vsub.f32 %v128_v35, %v1069_v49  ;;  %v1129_v32 = vsub.f32 %v3196_v54, %v3718_v27  ;;  %v3261_v25 = vpack.c.bf16 %v1235_v19, %v1228_v21 }
  0x7e   :  { %v1242_v35 = vand.u32 4294901760, %v1241_v11  ;;  %v1072_v33 = vand.u32 4294901760, %v129_v40  ;;  %v1075_v26 = vand.u32 4294901760, %v130_v42  ;;  %v3267_v27 = vpack.c.bf16 %v1123_v44, %v1116_v62 }
  0x7f   :  { %2468 = vmatpush3.bf16.msra.mxu1 %v2824_v18  ;;  %3814 = vst [vmem:[#allocation21_spill] sm:$0xff] %v3252_v28  ;;  %v1136_v18 = vsub.f32 %v3198_v41, %v3719_v16  ;;  %v1249_v49 = vand.u32 4294901760, %v1248_v61  ;;  %v3269_v16 = vsub.f32 %v111_v46, %v1018_v30  ;;  %v3727_v21 = vand.u32 4294901760, %v3237_v63 }
  0x80   :  { %2444 = vmatpush3.bf16.msra.mxu0 %v3094_v22  ;;  %2470 = vmatprep.subr.bf16.mxu1 %v2839_v51  ;;  %v3722_v22 = vand.u32 4294901760, %v3225_v17  ;;  %v3726_v51 = vand.u32 4294901760, %v3235_v13  ;;  %v3275_v19 = vpack.c.bf16 %v1021_v8, %v1018_v30  ;;  %v3277_v11 = vsub.f32 %v112_v2, %v1021_v8  ;;  %v131_v2 = vld [vmem:[#allocation12 + $0x1d0] sm:$0xff] }
  0x81   :  { %2446 = vmatprep.subr.bf16.mxu0 %v3159_v3  ;;  %3815 = vst [vmem:[#allocation23_spill] sm:$0xff] %v3269_v16  ;;  %v3724_v3 = vand.u32 4294901760, %v3232_v23  ;;  %v1130_v61 = vand.u32 4294901760, %v1129_v32  ;;  %v1137_v39 = vand.u32 4294901760, %v1136_v18  ;;  %v3289_v8 = vpack.c.bf16 %v1249_v49, %v1242_v35  ;;  %v132_v49 = vld [vmem:[#allocation12 + $0x1d8] sm:$0xff] }
  0x82   :  { %3816 = vst [vmem:[#allocation24_spill] sm:$0xff] %v3275_v19  ;;  %3817 = vst [vmem:[#allocation25_spill] sm:$0xff] %v3277_v11  ;;  %v1262_v46 = vsub.f32 %v3225_v17, %v3722_v22  ;;  %v3291_v32 = vpack.c.bf16 %v1075_v26, %v1072_v33  ;;  %v3296_v44 = vsub.f32 %v129_v40, %v1072_v33  ;;  %v1027_v30 = vand.u32 4294901760, %v114_v10 }
  0x83   :  { %2472 = vmatpush3.bf16.msra.mxu1 %v2854_v7  ;;  %v1255_v7 = vsub.f32 %v3213_v59, %v3723_v60  ;;  %v1143_v18 = vsub.f32 %v3232_v23, %v3724_v3  ;;  %v1150_v35 = vsub.f32 %v3237_v63, %v3727_v21  ;;  %v3306_v22 = vpack.c.bf16 %v1137_v39, %v1130_v61  ;;  %v116_v21 = vld [vmem:[#allocation12 + $0x158] sm:$0xff] }
  0x84   :  { %2448 = vmatpush3.bf16.msra.mxu0 %v3100_v29  ;;  %2474 = vmatprep.subr.bf16.mxu1 %v2869_v53  ;;  %v1024_v29 = vand.u32 4294901760, %v113_v56  ;;  %v1098_v53 = vsub.f32 %v3235_v13, %v3726_v51  ;;  %v3308_v60 = vsub.f32 %v130_v42, %v1075_v26  ;;  %v3730_v40 = vand.u32 4294901760, %v3269_v16 }
  0x85   :  { %2450 = vmatprep.subr.bf16.mxu0 %v3165_v48  ;;  %v3733_v33 = vand.u32 4294901760, %v3277_v11  ;;  %v1256_v3 = vand.u32 4294901760, %v1255_v7  ;;  %v1263_v6 = vand.u32 4294901760, %v1262_v46  ;;  %v1078_v51 = vand.u32 4294901760, %v131_v2 }
  0x86   :  { %v1099_v62 = vand.u32 4294901760, %v1098_v53  ;;  %v3313_v48 = vsub.f32 %v113_v56, %v1024_v29  ;;  %v3820_v42 = vand.u32 4294901760, %v3252_v28  ;;  %v3323_v61 = vpack.c.bf16 %v1027_v30, %v1024_v29 }
  0x87   :  { %2476 = vmatpush3.bf16.msra.mxu1 %v3797_v9  ;;  %v115_v9 = vld [vmem:[#allocation12 + $0x150] sm:$0xff]  ;;  %v1144_v7 = vand.u32 4294901760, %v1143_v18  ;;  %v1151_v46 = vand.u32 4294901760, %v1150_v35  ;;  %v1033_v56 = vand.u32 4294901760, %v116_v21  ;;  %v3339_v18 = vpack.c.bf16 %v1263_v6, %v1256_v3  ;;  %v3357_v3 = vld [vmem:[#allocation12 + $0x160] sm:$0xff] }
  0x88   :  { %2452 = vmatpush3.bf16.msra.mxu0 %v3171_v52  ;;  %2478 = vmatprep.subr.bf16.mxu1 %v3798_v43  ;;  %3818 = vst [vmem:[#allocation26_spill] sm:$0xff] %v3313_v48  ;;  %v1081_v52 = vand.u32 4294901760, %v132_v49  ;;  %v3819_v43 = vand.u32 4294901760, %v3248_v36  ;;  %v1276_v26 = vsub.f32 %v3252_v28, %v3820_v42  ;;  %v1030_v53 = vand.u32 4294901760, %v115_v9  ;;  %v3333_v28 = vld [vmem:[#allocation12 + $0x1e0] sm:$0xff] }
  0x89   :  { %2486 = vmatprep.subr.bf16.mxu0 %v3176_v38  ;;  %v1164_v42 = vsub.f32 %v3277_v11, %v3733_v33  ;;  %v3343_v35 = vsub.f32 %v131_v2, %v1078_v51  ;;  %v3351_v29 = vpack.c.bf16 %v1151_v46, %v1144_v7  ;;  %v3741_v6 = vand.u32 4294901760, %v3333_v28  ;;  %v3379_v7 = vld [vmem:[#allocation12 + $0x1f8] sm:$0xff] }
  0x8a   :  { %v1269_v39 = vsub.f32 %v3248_v36, %v3819_v43  ;;  %v1157_v43 = vsub.f32 %v3269_v16, %v3730_v40  ;;  %v3740_v40 = vand.u32 4294901760, %v3308_v60  ;;  %v3346_v16 = vpack.c.bf16 %v1081_v52, %v1078_v51 }
  0x8b   :  { %890 = vmatmul.mubr.f32.vlgmr.msra.gmra.mrb[4].mxu0 %v2975_v50  ;;  %2480 = vmatpush3.bf16.msra.mxu1 %v3799_v58  ;;  %v3335_v58 = vld [vmem:[#allocation12 + $0x1e8] sm:$0xff]  ;;  %3822 = vst [vmem:[#allocation28_spill] sm:$0xff] %v3343_v35  ;;  %v3348_v33 = vsub.f32 %v132_v49, %v1081_v52  ;;  %v3361_v51 = vpack.c.bf16 %v1033_v56, %v1030_v53  ;;  %v3743_v52 = vand.u32 4294901760, %v3313_v48 }
  0x8c   :  { %2488 = vmatpush3.bf16.msra.mxu0 %v3178_v12  ;;  %2482 = vmatprep.subr.bf16.mxu1 %v3800_v5  ;;  %v3341_v5 = vsub.f32 %v114_v10, %v1027_v30  ;;  %3823 = vst [vmem:[#allocation29_spill] sm:$0xff] %v3346_v16  ;;  %v1270_v11 = vand.u32 4294901760, %v1269_v39  ;;  %v1277_v12 = vand.u32 4294901760, %v1276_v26  ;;  %v3742_v10 = vand.u32 4294901760, %v3335_v58  ;;  %v3366_v49 = vld [vmem:[#allocation12 + $0x168] sm:$0xff]  ;;  %v3377_v26 = vld [vmem:[#allocation12 + $0x1f0] sm:$0xff] }
  0x8d   :  { %2490 = vmatprep.subr.bf16.mxu0 %v3188_v45  ;;  %1100 = vmatprep.mubr.f32.mxu0 %v1099_v62  ;;  %3824 = vst [vmem:[#allocation30_spill] sm:$0xff] %v3348_v33  ;;  %v3353_v45 = vsub.f32 %v115_v9, %v1030_v53  ;;  %v1158_v2 = vand.u32 4294901760, %v1157_v43  ;;  %v1165_v62 = vand.u32 4294901760, %v1164_v42  ;;  %v1871_v9 = vld [vmem:[%s3666_s1] sm:$0xff]  ;;  %v3383_v43 = vsub.f32 %v116_v21, %v1033_v56 }
  0x8e   :  { %3821 = vst [vmem:[#allocation27_spill] sm:$0xff] %v3341_v5  ;;  %v3744_v39 = vand.u32 4294901760, %v3341_v5  ;;  %v2529_v53 = vpack.c.bf16 %v1277_v12, %v1270_v11  ;;  %v1036_v42 = vand.u32 4294901760, %v3357_v3  ;;  %v3396_v46 = vsub.f32 %v3335_v58, %v3742_v10  ;;  %v3407_v10 = vld [vmem:[#allocation12 + $0x178] sm:$0xff] }
  0x8f   :  { %2484 = vmatpush3.bf16.msra.mxu1 %v3802_v47  ;;  %v3825_v47 = vand.u32 4294901760, %v3296_v44  ;;  %v55_v12 = vmax.f32 %v3810_v20, %v1871_v9  ;;  %v1171_v20 = vsub.f32 %v3313_v48, %v3743_v52  ;;  %v3827_v9 = vand.u32 4294901760, %v3348_v33 }
  0x90   :  { %2492 = vmatpush3.bf16.msra.mxu0 %v3190_v4  ;;  %2518 = vmatprep.subr.bf16.mxu1 %v3261_v25  ;;  %v1290_v25 = vsub.f32 %v3308_v60, %v3740_v40  ;;  %v3391_v40 = vsub.f32 %v3333_v28, %v3741_v6  ;;  %v3405_v6 = vld [vmem:[#allocation12 + $0x170] sm:$0xff] }
  0x91   :  { %v1283_v30 = vsub.f32 %v3296_v44, %v3825_v47  ;;  %2494 = vmatprep.subr.bf16.mxu0 %v3201_v31  ;;  %v1304_v56 = vsub.f32 %v3348_v33, %v3827_v9 }
  0x92   :  { %994 = vmatmul.mubr.f32.vlgmr.msra.gmra.mrb[4].mxu1 %v2975_v50  ;;  %v1039_v50 = vand.u32 4294901760, %v3366_v49  ;;  %v1291_v47 = vand.u32 4294901760, %v1290_v25  ;;  %v3761_v11 = vand.u32 4294901760, %v3391_v40 }
  0x93   :  { %2520 = vmatpush3.bf16.msra.mxu1 %v3267_v27  ;;  %1336 = vmatprep.mubr.f32.mxu1 %v3221_v14  ;;  %v2531_v27 = vpack.c.bf16 %v1165_v62, %v1158_v2  ;;  %v1284_v21 = vand.u32 4294901760, %v1283_v30  ;;  %v3826_v2 = vand.u32 4294901760, %v3343_v35  ;;  %v3420_v30 = vsub.f32 %v3357_v3, %v1036_v42 }
  0x94   :  { %2496 = vmatpush3.bf16.msra.mxu0 %v3227_v24  ;;  %2522 = vmatprep.subr.bf16.mxu1 %v3289_v8  ;;  %v1178_v8 = vsub.f32 %v3341_v5, %v3744_v39  ;;  %v3429_v52 = vsub.f32 %v3366_v49, %v1039_v50  ;;  %v1042_v39 = vand.u32 4294901760, %v3405_v6  ;;  %v3433_v14 = vand.u32 4294901760, %v55_v12 }
  0x95   :  { %2498 = vmatprep.subr.bf16.mxu0 %v3239_v1  ;;  %v1297_v62 = vsub.f32 %v3343_v35, %v3826_v2  ;;  %v1045_v2 = vand.u32 4294901760, %v3407_v10  ;;  %v3828_v3 = vand.u32 4294901760, %v3377_v26  ;;  %v2533_v1 = vpack.c.bf16 %v1291_v47, %v1284_v21 }
  0x96   :  { %v1179_v24 = vand.u32 4294901760, %v1178_v8  ;;  %v1305_v33 = vand.u32 4294901760, %v1304_v56  ;;  %v3830_v35 = vand.u32 4294901760, %v3353_v45  ;;  %v3831_v5 = vand.u32 4294901760, %v3383_v43 }
  0x97   :  { %2524 = vmatpush3.bf16.msra.mxu1 %v3306_v22  ;;  %v3440_v9 = vsub.f32 %v3377_v26, %v3828_v3  ;;  %v3829_v22 = vand.u32 4294901760, %v3379_v7  ;;  %v3459_v25 = vsub.f32 %v3405_v6, %v1042_v39  ;;  %v3462_v47 = vsub.f32 %v3407_v10, %v1045_v2 }
  0x98   :  { %2500 = vmatpush3.bf16.msra.mxu0 %v3275_v19  ;;  %2526 = vmatprep.subr.bf16.mxu1 %v3339_v18  ;;  %v1172_v19 = vand.u32 4294901760, %v1171_v20  ;;  %v1298_v18 = vand.u32 4294901760, %v1297_v62  ;;  %v1185_v3 = vsub.f32 %v3353_v45, %v3830_v35  ;;  %v3465_v21 = vsub.f32 %v55_v12, %v3433_v14 }
  0x99   :  { %v3445_v49 = vsub.f32 %v3379_v7, %v3829_v22  ;;  %2502 = vmatprep.subr.bf16.mxu0 %v3291_v32  ;;  %v1192_v22 = vsub.f32 %v3383_v43, %v3831_v5  ;;  %v1311_v5 = vsub.f32 %v3391_v40, %v3761_v11  ;;  %v3833_v12 = vand.u32 4294901760, %v3333_v28 }
  0x9a   :  { %v3834_v20 = vand.u32 4294901760, %v3335_v58  ;;  %v2535_v62 = vpack.c.bf16 %v1179_v24, %v1172_v19  ;;  %v2537_v11 = vpack.c.bf16 %v1305_v33, %v1298_v18  ;;  %v1186_v56 = vand.u32 4294901760, %v1185_v3 }
  0x9b   :  { %2528 = vmatpush3.bf16.msra.mxu1 %v3351_v29  ;;  %v3832_v29 = vand.u32 4294901760, %v3396_v46  ;;  %v1193_v48 = vand.u32 4294901760, %v1192_v22  ;;  %v1103_v10 = vand.u32 4294901760, %v3465_v21  ;;  %v1212_v58 = vand.u32 4294901760, %v3459_v25 }
  0x9c   :  { %2504 = vmatpush3.bf16.msra.mxu0 %v3323_v61  ;;  %2530 = vmatprep.subr.bf16.mxu1 %v2529_v53  ;;  %v3482_v8 = vpack.c.bf16 %v3834_v20, %v3833_v12  ;;  %v3484_v53 = vpack.c.bf16 %v1039_v50, %v1036_v42  ;;  %v1219_v42 = vand.u32 4294901760, %v3462_v47  ;;  %v1312_v24 = vand.u32 4294901760, %v1311_v5 }
  0x9d   :  { %v1318_v35 = vsub.f32 %v3396_v46, %v3832_v29  ;;  %2506 = vmatprep.subr.bf16.mxu0 %v3346_v16  ;;  %v3835_v29 = vand.u32 4294901760, %v3420_v30  ;;  %v3836_v16 = vand.u32 4294901760, %v3429_v52  ;;  %v3837_v33 = vand.u32 4294901760, %v3440_v9 }
  0x9e   :  { %v3840_v3 = vand.u32 4294901760, %v3379_v7  ;;  %v2539_v12 = vpack.c.bf16 %v1193_v48, %v1186_v56  ;;  %v1104_v5 = vsub.f32 %v3465_v21, %v1103_v10  ;;  %v1213_v20 = vsub.f32 %v3459_v25, %v1212_v58 }
  0x9f   :  { %v1199_v6 = vsub.f32 %v3420_v30, %v3835_v29  ;;  %2532 = vmatpush3.bf16.msra.mxu1 %v2531_v27  ;;  %v1206_v28 = vsub.f32 %v3429_v52, %v3836_v16  ;;  %v1319_v19 = vand.u32 4294901760, %v1318_v35  ;;  %v1325_v50 = vsub.f32 %v3440_v9, %v3837_v33 }
  0xa0   :  { %2508 = vmatpush3.bf16.msra.mxu0 %v3361_v51  ;;  %2534 = vmatprep.subr.bf16.mxu1 %v2533_v1  ;;  %v3838_v27 = vand.u32 4294901760, %v3445_v49  ;;  %v3839_v16 = vand.u32 4294901760, %v3377_v26  ;;  %v1220_v26 = vsub.f32 %v3462_v47, %v1219_v42  ;;  %v3519_v7 = vpack.c.bf16 %v1045_v2, %v1042_v39 }
  0xa1   :  { %2510 = vmatprep.subr.bf16.mxu0 %v3482_v8  ;;  %v1200_v1 = vand.u32 4294901760, %v1199_v6  ;;  %v1207_v35 = vand.u32 4294901760, %v1206_v28  ;;  %v2541_v48 = vpack.c.bf16 %v1319_v19, %v1312_v24  ;;  %v1326_v56 = vand.u32 4294901760, %v1325_v50 }
  0xa2   :  { %v1332_v18 = vsub.f32 %v3445_v49, %v3838_v27  ;;  %v3507_v22 = vpack.c.bf16 %v3840_v3, %v3839_v16  ;;  %v1105_v29 = vand.u32 4294901760, %v1104_v5  ;;  %v1214_v33 = vand.u32 4294901760, %v1213_v20  ;;  %v3841_v16 = vld [vmem:[#allocation21_spill] sm:$0xff]  ;;  %v3844_v5 = vld [vmem:[#allocation18_spill] sm:$0xff] }
  0xa3   :  { %2536 = vmatpush3.bf16.msra.mxu1 %v2535_v62  ;;  %v2549_v62 = vpack.c.bf16 %v3143_v34, %v3141_v55  ;;  %v2543_v28 = vpack.c.bf16 %v1207_v35, %v1200_v1  ;;  %v1221_v27 = vand.u32 4294901760, %v1220_v26  ;;  %v2551_v39 = vpack.c.bf16 %v3150_v15, %v3148_v0  ;;  %v3845_v35 = vld [vmem:[#allocation23_spill] sm:$0xff]  ;;  %v3846_v20 = vld [vmem:[#allocation25_spill] sm:$0xff] }
  0xa4   :  { %2512 = vmatpush3.bf16.msra.mxu0 %v3484_v53  ;;  %2538 = vmatprep.subr.bf16.mxu1 %v2537_v11  ;;  %v1333_v6 = vand.u32 4294901760, %v1332_v18  ;;  %v2553_v2 = vpack.c.bf16 %v3182_v57, %v3180_v37  ;;  %v2555_v19 = vpack.c.bf16 %v3198_v41, %v3196_v54  ;;  %v2557_v50 = vpack.c.bf16 %v3225_v17, %v3213_v59 }
  0xa5   :  { %2514 = vmatprep.subr.bf16.mxu0 %v3507_v22  ;;  %v2547_v24 = vpack.c.bf16 %v1221_v27, %v1214_v33  ;;  %v2559_v18 = vpack.c.bf16 %v3237_v63, %v3232_v23  ;;  %v2561_v3 = vpack.c.bf16 %v3841_v16, %v3248_v36  ;;  %v3843_v1 = vand.u32 4294901760, %v3235_v13  ;;  %v3851_v33 = vld [vmem:[#allocation20_spill] sm:$0xff]  ;;  %v3852_v27 = vld [vmem:[#allocation22_spill] sm:$0xff] }
  0xa6   :  { %v2545_v11 = vpack.c.bf16 %v1333_v6, %v1326_v56  ;;  %v2563_v26 = vpack.c.bf16 %v3846_v20, %v3845_v35  ;;  %v3847_v56 = vld [vmem:[#allocation26_spill] sm:$0xff]  ;;  %v3848_v6 = vld [vmem:[#allocation27_spill] sm:$0xff] }
  0xa7   :  { %2540 = vmatpush3.bf16.msra.mxu1 %v2539_v12  ;;  %v3842_v12 = vld [vmem:[#allocation17_spill] sm:$0xff] }
  0xa8   :  { %2516 = vmatpush3.bf16.msra.mxu0 %v3519_v7  ;;  %2542 = vmatprep.subr.bf16.mxu1 %v2541_v48  ;;  %v2565_v48 = vpack.c.bf16 %v3308_v60, %v3296_v44 }
  0xa9   :  { %2550 = vmatprep.subr.bf16.mxu0 %v2549_v62  ;;  %v2567_v62 = vpack.c.bf16 %v3848_v6, %v3847_v56 }
  0xab   :  { %1106 = vmatmul.mubr.f32.vlgmr.msra.gmra.mrb[6].mxu0 %v1105_v29  ;;  %2544 = vmatpush3.bf16.msra.mxu1 %v2543_v28  ;;  %v3850_v29 = vld [vmem:[#allocation30_spill] sm:$0xff] }
  0xac   :  { %2552 = vmatpush3.bf16.msra.mxu0 %v2551_v39  ;;  %2546 = vmatprep.subr.bf16.mxu1 %v2545_v11  ;;  %v2571_v39 = vpack.c.bf16 %v3383_v43, %v3353_v45  ;;  %v2573_v11 = vpack.c.bf16 %v3396_v46, %v3391_v40 }
  0xad   :  { %2554 = vmatprep.subr.bf16.mxu0 %v2553_v2  ;;  %1473 = vmatprep.mubr.f32.mxu0 %v3235_v13  ;;  %v3849_v13 = vld [vmem:[#allocation28_spill] sm:$0xff] }
  0xae   :  { %v2569_v28 = vpack.c.bf16 %v3850_v29, %v3849_v13  ;;  %v3853_v2 = vld [vmem:[#allocation24_spill] sm:$0xff] }
  0xaf   :  { %2548 = vmatpush3.bf16.msra.mxu1 %v2547_v24  ;;  %v2575_v24 = vpack.c.bf16 %v3429_v52, %v3420_v30 }
  0xb0   :  { %2556 = vmatpush3.bf16.msra.mxu0 %v2555_v19  ;;  %2582 = vmatprep.subr.bf16.mxu1 %v3176_v38  ;;  %v2577_v19 = vpack.c.bf16 %v3445_v49, %v3440_v9 }
  0xb1   :  { %2558 = vmatprep.subr.bf16.mxu0 %v2557_v50  ;;  %v3854_v50 = vld [vmem:[#allocation29_spill] sm:$0xff] }
  0xb2   :  { %1338 = vmatmul.mubr.f32.vlgmr.msra.gmra.mrb[6].mxu1 %v3433_v14 }
  0xb3   :  { %2584 = vmatpush3.bf16.msra.mxu1 %v3842_v12  ;;  %1580 = vmatprep.mubr.f32.mxu1 %v3843_v1  ;;  %v3856_v1 = vand.u32 4294901760, %v3143_v34  ;;  %v3862_v34 = vand.u32 4294901760, %v3198_v41  ;;  %v3868_v41 = vand.u32 4294901760, %v3248_v36  ;;  %v3873_v36 = vand.u32 4294901760, %v3308_v60 }
  0xb4   :  { %2560 = vmatpush3.bf16.msra.mxu0 %v2559_v18  ;;  %2586 = vmatprep.subr.bf16.mxu1 %v3844_v5  ;;  %v2579_v18 = vpack.c.bf16 %v3462_v47, %v3459_v25 }
  0xb5   :  { %2562 = vmatprep.subr.bf16.mxu0 %v2561_v3  ;;  %v3855_v3 = vand.u32 4294901760, %v3141_v55  ;;  %v3861_v55 = vand.u32 4294901760, %v3196_v54  ;;  %v3867_v54 = vand.u32 4294901760, %v3237_v63  ;;  %v3872_v63 = vand.u32 4294901760, %v3296_v44 }
  0xb6   :  { %v3880_v44 = vand.u32 4294901760, %v3391_v40 }
  0xb7   :  { %2588 = vmatpush3.bf16.msra.mxu1 %v3190_v4 }
  0xb8   :  { %2564 = vmatpush3.bf16.msra.mxu0 %v2563_v26  ;;  %2590 = vmatprep.subr.bf16.mxu1 %v3201_v31  ;;  %v2613_v26 = vpack.c.bf16 %v3856_v1, %v3855_v3 }
  0xb9   :  { %2566 = vmatprep.subr.bf16.mxu0 %v2565_v48  ;;  %v3857_v48 = vand.u32 4294901760, %v3148_v0  ;;  %v2619_v0 = vpack.c.bf16 %v3862_v34, %v3861_v55 }
  0xbb   :  { %2592 = vmatpush3.bf16.msra.mxu1 %v3851_v33 }
  0xbc   :  { %2568 = vmatpush3.bf16.msra.mxu0 %v2567_v62  ;;  %2594 = vmatprep.subr.bf16.mxu1 %v3852_v27  ;;  %v3858_v62 = vand.u32 4294901760, %v3150_v15  ;;  %v3863_v15 = vand.u32 4294901760, %v3213_v59  ;;  %v3869_v59 = vand.u32 4294901760, %v3841_v16  ;;  %v2629_v16 = vpack.c.bf16 %v3873_v36, %v3872_v63 }
  0xbd   :  { %2570 = vmatprep.subr.bf16.mxu0 %v2569_v28 }
  0xbe   :  { %v2615_v28 = vpack.c.bf16 %v3858_v62, %v3857_v48  ;;  %v2625_v1 = vpack.c.bf16 %v3869_v59, %v3868_v41 }
  0xbf   :  { %2596 = vmatpush3.bf16.msra.mxu1 %v3853_v2 }
  0xc0   :  { %2572 = vmatpush3.bf16.msra.mxu0 %v2571_v39  ;;  %2598 = vmatprep.subr.bf16.mxu1 %v3291_v32  ;;  %v3859_v39 = vand.u32 4294901760, %v3180_v37  ;;  %v3864_v37 = vand.u32 4294901760, %v3225_v17  ;;  %v3871_v17 = vand.u32 4294901760, %v3846_v20 }
  0xc1   :  { %2574 = vmatprep.subr.bf16.mxu0 %v2573_v11  ;;  %v3860_v11 = vand.u32 4294901760, %v3182_v57  ;;  %v3865_v57 = vld [vmem:[#allocation19_spill] sm:$0xff] }
  0xc3   :  { %2600 = vmatpush3.bf16.msra.mxu1 %v3323_v61 }
  0xc4   :  { %2576 = vmatpush3.bf16.msra.mxu0 %v2575_v24  ;;  %2602 = vmatprep.subr.bf16.mxu1 %v3854_v50  ;;  %v2617_v24 = vpack.c.bf16 %v3860_v11, %v3859_v39 }
  0xc5   :  { %2578 = vmatprep.subr.bf16.mxu0 %v2577_v19  ;;  %v2621_v19 = vpack.c.bf16 %v3864_v37, %v3863_v15 }
  0xc7   :  { %2604 = vmatpush3.bf16.msra.mxu1 %v3361_v51 }
  0xc8   :  { %2580 = vmatpush3.bf16.msra.mxu0 %v2579_v18  ;;  %2606 = vmatprep.subr.bf16.mxu1 %v3482_v8  ;;  %v3866_v18 = vand.u32 4294901760, %v3232_v23 }
  0xc9   :  { %2614 = vmatprep.subr.bf16.mxu0 %v2613_v26 }
  0xca   :  { %v2623_v3 = vpack.c.bf16 %v3867_v54, %v3866_v18 }
  0xcb   :  { %1476 = vmatmul.mubr.f32.vlgmr.msra.gmra.mrb[8].mxu0 %v3465_v21  ;;  %2608 = vmatpush3.bf16.msra.mxu1 %v3484_v53  ;;  %v3874_v21 = vand.u32 4294901760, %v3847_v56  ;;  %v3881_v56 = vand.u32 4294901760, %v3396_v46 }
  0xcc   :  { %2616 = vmatpush3.bf16.msra.mxu0 %v2615_v28  ;;  %2610 = vmatprep.subr.bf16.mxu1 %v3507_v22 }
  0xcd   :  { %2618 = vmatprep.subr.bf16.mxu0 %v2617_v24  ;;  %1750 = vmatprep.mubr.f32.mxu0 %v3865_v57 }
  0xcf   :  { %2612 = vmatpush3.bf16.msra.mxu1 %v3519_v7 }
  0xd0   :  { %2620 = vmatpush3.bf16.msra.mxu0 %v2619_v0  ;;  %2646 = vmatprep.subr.bf16.mxu1 %v3176_v38  ;;  %v3870_v38 = vand.u32 4294901760, %v3845_v35  ;;  %v3877_v35 = vand.u32 4294901760, %v3850_v29  ;;  %v3883_v29 = vand.u32 4294901760, %v3429_v52 }
  0xd1   :  { %2622 = vmatprep.subr.bf16.mxu0 %v2621_v19 }
  0xd2   :  { %1584 = vmatmul.mubr.f32.vlgmr.msra.gmra.mrb[8].mxu1 %v1103_v10  ;;  %v2627_v23 = vpack.c.bf16 %v3871_v17, %v3870_v38  ;;  %v3875_v10 = vand.u32 4294901760, %v3848_v6  ;;  %v2637_v6 = vpack.c.bf16 %v3881_v56, %v3880_v44 }
  0xd3   :  { %2648 = vmatpush3.bf16.msra.mxu1 %v3842_v12  ;;  %1854 = vmatprep.mubr.f32.mxu1 %v3865_v57 }
  0xd4   :  { %2624 = vmatpush3.bf16.msra.mxu0 %v2623_v3  ;;  %2650 = vmatprep.subr.bf16.mxu1 %v3844_v5  ;;  %v2631_v12 = vpack.c.bf16 %v3875_v10, %v3874_v21  ;;  %v3876_v5 = vand.u32 4294901760, %v3849_v13  ;;  %v3882_v13 = vand.u32 4294901760, %v3420_v30 }
  0xd5   :  { %2626 = vmatprep.subr.bf16.mxu0 %v2625_v1 }
  0xd6   :  { %v2633_v20 = vpack.c.bf16 %v3877_v35, %v3876_v5 }
  0xd7   :  { %2652 = vmatpush3.bf16.msra.mxu1 %v3190_v4  ;;  %v3878_v4 = vand.u32 4294901760, %v3353_v45  ;;  %v3884_v45 = vand.u32 4294901760, %v3440_v9 }
  0xd8   :  { %2628 = vmatpush3.bf16.msra.mxu0 %v2627_v23  ;;  %2654 = vmatprep.subr.bf16.mxu1 %v3201_v31  ;;  %v3879_v31 = vand.u32 4294901760, %v3383_v43  ;;  %v3885_v43 = vand.u32 4294901760, %v3445_v49 }
  0xd9   :  { %2630 = vmatprep.subr.bf16.mxu0 %v2629_v16 }
  0xda   :  { %v2635_v60 = vpack.c.bf16 %v3879_v31, %v3878_v4 }
  0xdb   :  { %2656 = vmatpush3.bf16.msra.mxu1 %v3851_v33  ;;  %v2639_v33 = vpack.c.bf16 %v3883_v29, %v3882_v13 }
  0xdc   :  { %2632 = vmatpush3.bf16.msra.mxu0 %v2631_v12  ;;  %2658 = vmatprep.subr.bf16.mxu1 %v3852_v27  ;;  %v2641_v27 = vpack.c.bf16 %v3885_v43, %v3884_v45 }
  0xdd   :  { %2634 = vmatprep.subr.bf16.mxu0 %v2633_v20 }
  0xdf   :  { %2660 = vmatpush3.bf16.msra.mxu1 %v3853_v2 }
  0xe0   :  { %2636 = vmatpush3.bf16.msra.mxu0 %v2635_v60  ;;  %2662 = vmatprep.subr.bf16.mxu1 %v3291_v32  ;;  %v2643_v32 = vpack.c.bf16 %v1219_v42, %v1212_v58 }
  0xe1   :  { %2638 = vmatprep.subr.bf16.mxu0 %v2637_v6 }
  0xe3   :  { %2664 = vmatpush3.bf16.msra.mxu1 %v3323_v61 }
  0xe4   :  { %2640 = vmatpush3.bf16.msra.mxu0 %v2639_v33  ;;  %2666 = vmatprep.subr.bf16.mxu1 %v3854_v50 }
  0xe5   :  { %2642 = vmatprep.subr.bf16.mxu0 %v2641_v27 }
  0xe7   :  { %2668 = vmatpush3.bf16.msra.mxu1 %v3361_v51 }
  0xe8   :  { %2644 = vmatpush3.bf16.msra.mxu0 %v2643_v32  ;;  %2670 = vmatprep.subr.bf16.mxu1 %v3482_v8 }
  0xeb   :  { %1752 = vmatmul.mubr.f32.vlgmr.msra.gmra.mrb[10].mxu0 %v3433_v14  ;;  %2672 = vmatpush3.bf16.msra.mxu1 %v3484_v53 }
  0xec   :  { %2674 = vmatprep.subr.bf16.mxu1 %v3507_v22 }
  0xef   :  { %2676 = vmatpush3.bf16.msra.mxu1 %v3519_v7 }
  0xf2   :  { %1856 = vmatmul.mubr.f32.vlgmr.msra.gmra.mrb[10].mxu1 %v3433_v14 }
 0x11e   :  { %v1905_v40 = vpop.f32.mrb[0].mxu0 }
 0x11f   :  { %v1906_v61 = vpop.f32.mrb[1].mxu0 }
 0x120   :  { %v1907_v52 = vadd.f32 %v1906_v61, %v1905_v40 }
 0x125   :  { %v1940_v46 = vpop.f32.mrb[0].mxu1 }
 0x126   :  { %v1941_v30 = vpop.f32.mrb[1].mxu1 }
 0x127   :  { %v1942_v25 = vadd.f32 %v1941_v30, %v1940_v46 }
 0x129   :  { %v478_v51 = vadd.f32 %v1942_v25, %v1907_v52 }
 0x13e   :  { %v1975_v9 = vpop.f32.mrb[2].mxu0 }
 0x13f   :  { %v1976_v49 = vpop.f32.mrb[3].mxu0 }
 0x140   :  { %v1977_v47 = vadd.f32 %v1976_v49, %v1975_v9 }
 0x142   :  { %v616_v8 = vadd.f32 %v1977_v47, %v478_v51 }
 0x145   :  { %v2010_v58 = vpop.f32.mrb[2].mxu1 }
 0x146   :  { %v2011_v42 = vpop.f32.mrb[3].mxu1 }
 0x147   :  { %v2012_v53 = vadd.f32 %v2011_v42, %v2010_v58 }
 0x149   :  { %v724_v2 = vadd.f32 %v2012_v53, %v616_v8 }
 0x15e   :  { %v2045_v22 = vpop.f32.mrb[4].mxu0 }
 0x15f   :  { %v2046_v50 = vpop.f32.mrb[5].mxu0 }
 0x160   :  { %v2047_v7 = vadd.f32 %v2046_v50, %v2045_v22 }
 0x162   :  { %v892_v26 = vadd.f32 %v2047_v7, %v724_v2 }
 0x165   :  { %v2080_v14 = vpop.f32.mrb[4].mxu1 }
 0x166   :  { %v2081_v48 = vpop.f32.mrb[5].mxu1 }
 0x167   :  { %v2082_v62 = vadd.f32 %v2081_v48, %v2080_v14 }
 0x169   :  { %v996_v28 = vadd.f32 %v2082_v62, %v892_v26 }
 0x17e   :  { %v2115_v39 = vpop.f32.mrb[6].mxu0 }
 0x17f   :  { %v2116_v11 = vpop.f32.mrb[7].mxu0 }
 0x180   :  { %v2117_v24 = vadd.f32 %v2116_v11, %v2115_v39 }
 0x182   :  { %v1108_v55 = vadd.f32 %v2117_v24, %v996_v28 }
 0x185   :  { %v2150_v34 = vpop.f32.mrb[6].mxu1 }
 0x186   :  { %v2151_v0 = vpop.f32.mrb[7].mxu1 }
 0x187   :  { %v2152_v15 = vadd.f32 %v2151_v0, %v2150_v34 }
 0x189   :  { %v1340_v37 = vadd.f32 %v2152_v15, %v1108_v55 }
 0x19e   :  { %v2185_v19 = vpop.f32.mrb[8].mxu0 }
 0x19f   :  { %v2186_v57 = vpop.f32.mrb[9].mxu0 }
 0x1a0   :  { %v2187_v18 = vadd.f32 %v2186_v57, %v2185_v19 }
 0x1a2   :  { %v1478_v54 = vadd.f32 %v2187_v18, %v1340_v37 }
 0x1a5   :  { %v2220_v3 = vpop.f32.mrb[8].mxu1 }
 0x1a6   :  { %v2221_v41 = vpop.f32.mrb[9].mxu1 }
 0x1a7   :  { %v2222_v59 = vadd.f32 %v2221_v41, %v2220_v3 }
 0x1a9   :  { %v1586_v1 = vadd.f32 %v2222_v59, %v1478_v54 }
 0x1be   :  { %v2255_v38 = vpop.f32.mrb[10].mxu0 }
 0x1bf   :  { %v2256_v17 = vpop.f32.mrb[11].mxu0 }
 0x1c0   :  { %v2257_v23 = vadd.f32 %v2256_v17, %v2255_v38 }
 0x1c2   :  { %v1754_v63 = vadd.f32 %v2257_v23, %v1586_v1 }
 0x1c5   :  { %v2290_v36 = vpop.f32.mrb[10].mxu1 }
 0x1c6   :  { %v2291_v16 = vpop.f32.mrb[11].mxu1 }
 0x1c7   :  { %v2292_v21 = vadd.f32 %v2291_v16, %v2290_v36 }
 0x1c9   :  { %v1858_v10 = vadd.f32 %v2292_v21, %v1754_v63 }
 0x1cb   :  { %1861 = vst [vmem:[%s3669_s4] sm:$0xff] %v1858_v10 }
 0x1cc   :  { %1866 = vsyncpa [#allocation13], 1 }

</bundles_post_ra>
